<compile_context>
chip_gen: v7x
topology: tpu7x:2x2x1
jax: 0.10.0
libtpu: 0.0.40
codegen_flags: <defaults>
</compile_context>

<pallas_src>
import functools

import jax
import jax.numpy as jnp
from jax import lax
from jax.experimental import pallas as pl
from jax.experimental.pallas import tpu as pltpu


def _round_up(x, m):
    return (x + m - 1) // m * m


def _mean_pool_kernel(tok_ref, tbl_ref, out_ref):
    toks = tok_ref[...]                          # [TN, S] int32
    tn, s_dim = toks.shape
    v_dim = tbl_ref.shape[0]

    # token_weights = ne(0) / (sum(ne(0)) + 1e-9)   (matches torch.no_grad block)
    w = (toks != 0).astype(jnp.float32)          # [TN, S]
    norm = jnp.sum(w, axis=-1, keepdims=True)    # [TN, 1]
    w = w / (norm + 1e-9)

    # (1, V) iota; broadcast implicitly against [TN, 1] tokens -> fewer vregs.
    vocab_iota = lax.broadcasted_iota(jnp.int32, (1, v_dim), 1)

    counts = jnp.zeros((tn, v_dim), jnp.float32)
    for s in range(s_dim):                       # S is small & static -> unrolled
        tok_s = toks[:, s:s + 1]                 # [TN, 1]
        w_s = w[:, s:s + 1]                      # [TN, 1]
        # select folds compare+convert+mul into one VALU op per element
        counts = counts + jnp.where(vocab_iota == tok_s, w_s, 0.0)

    # weighted sum of embedding rows == counts @ table  (single MXU matmul)
    out_ref[...] = jnp.dot(counts, tbl_ref[...],
                           preferred_element_type=jnp.float32)


def _max_pool_kernel(tok_ref, tbl_ref, out_ref):
    toks = tok_ref[...]                          # [TN, S] int32
    tn, s_dim = toks.shape
    v_dim, e_dim = tbl_ref.shape

    vocab_iota = lax.broadcasted_iota(jnp.int32, (1, v_dim), 1)

    # Stack the S one-hots along the sublane axis -> one long MXU matmul
    # instead of S small ones (removes S-1 pipeline-fill/FIFO-drain phases).
    onehots = [jnp.where(vocab_iota == toks[:, s:s + 1], 1.0, 0.0)
               for s in range(s_dim)]            # S x [TN, V]
    stacked = jnp.concatenate(onehots, axis=0)   # [S*TN, V]
    emb = jnp.dot(stacked, tbl_ref[...],
                  preferred_element_type=jnp.float32)        # [S*TN, E]

    result = emb[0:tn]                           # [TN, E]
    for s in range(1, s_dim):                    # cheap VPU max reduction
        result = jnp.maximum(result, emb[s * tn:(s + 1) * tn])

    out_ref[...] = result


@functools.partial(jax.jit, static_argnames=("embedding_type", "tile_n"))
def subtoken_embeddings(subtokens, table, *, embedding_type="sum", tile_n=256):
    """Pallas implementation of SubtokenEmbeddings.forward.

    subtokens: int32 [B, L, S], table: f32 [V, E]. Returns f32 [B, L, E].
    tile_n: token-tile rows; 256 fills the v6e/v7x MXU, any multiple of 128
            saturates v5e.
    """
    B, L, S = subtokens.shape
    V, E = table.shape
    N = B * L

    # Pad the flattened token axis to a multiple of the tile. Padded rows are
    # all pad-token (0): weight 0 (mean path) / table row 0 (max path); they
    # are sliced away below, so semantics are unchanged.
    n_pad = _round_up(max(N, 1), tile_n)
    toks = subtokens.reshape(N, S)
    if n_pad != N:
        toks = jnp.pad(toks, ((0, n_pad - N), (0, 0)))

    kernel = _max_pool_kernel if embedding_type == "max_pool" else _mean_pool_kernel

    # Rough f32 working-set estimate (token/output tiles double-buffered,
    # resident table double-buffered, one-hot intermediates). Only raise the
    # scoped-VMEM limit when actually needed so the default works everywhere.
    est_bytes = 4 * (2 * tile_n * S + 2 * V * E + 2 * tile_n * E
                     + (S + 2) * tile_n * V)
    vmem_limit = None
    if est_bytes > 16 * 1024 * 1024:
        vmem_limit = int(min(2 * est_bytes, 96 * 1024 * 1024))

    out = pl.pallas_call(
        kernel,
        out_shape=jax.ShapeDtypeStruct((n_pad, E), jnp.float32),
        grid=(n_pad // tile_n,),
        in_specs=[
            pl.BlockSpec((tile_n, S), lambda i: (i, 0)),   # token tile
            pl.BlockSpec((V, E), lambda i: (0, 0)),        # full table, resident
        ],
        out_specs=pl.BlockSpec((tile_n, E), lambda i: (i, 0)),
        compiler_params=pltpu.CompilerParams(
            dimension_semantics=("parallel",),             # megacore-shardable
            vmem_limit_bytes=vmem_limit),
    )(toks, table)

    return out[:N].reshape(B, L, E)


def _reference(subtokens, table, embedding_type):
    emb = table[subtokens]                                  # [B, L, S, E]
    if embedding_type == "max_pool":
        return emb.max(axis=-2)
    w = (subtokens != 0).astype(jnp.float32)
    norm = w.sum(axis=-1, keepdims=True)
    w = w / (norm + 1e-9)
    return (emb * w[..., None]).sum(axis=-2)


if __name__ == "__main__":
    # config: vocabulary_size=128, embedding_size=32, pad_token_id=0
    B, L, S = 2, 8, 4
    V, E = 128, 32

    key = jax.random.PRNGKey(0)
    k_tbl, k_tok, k_pad = jax.random.split(key, 3)

    # nn.Embedding init ~ N(0,1); padding_idx row is zeroed at init.
    table = jax.random.normal(k_tbl, (V, E), dtype=jnp.float32)
    table = table.at[0].set(0.0)

    subtokens = jax.random.randint(k_tok, (B, L, S), 0, V, dtype=jnp.int32)
    # sprinkle some pad (0) subtokens so the weighting path is exercised
    pad_mask = jax.random.bernoulli(k_pad, 0.3, (B, L, S))
    subtokens = jnp.where(pad_mask, 0, subtokens)

    # Mirrors the module's host-side assert (not expressible inside the kernel).
    assert int(subtokens.max()) < V, "Found token not in vocabulary"

    # default (weighted mean / sum) path
    out_sum = subtoken_embeddings(subtokens, table, embedding_type="sum")
    jax.block_until_ready(out_sum)
    ref_sum = _reference(subtokens, table, "sum")
    assert out_sum.shape == (B, L, E)
    assert jnp.allclose(out_sum, ref_sum, atol=1e-5, rtol=1e-5)

    # max_pool path
    out_max = subtoken_embeddings(subtokens, table, embedding_type="max_pool")
    jax.block_until_ready(out_max)
    ref_max = _reference(subtokens, table, "max_pool")
    assert jnp.allclose(out_max, ref_max, atol=1e-5, rtol=1e-5)

    print("KERNEL_OK")
</pallas_src>

<mosaic_0001>
module attributes {stable_mosaic.version = 11 : i64} {
  func.func @_mean_pool_kernel(%arg0: i32, %arg1: memref<256x4xi32, #tpu.memory_space<vmem>>, %arg2: memref<128x32xf32, #tpu.memory_space<vmem>>, %arg3: memref<256x32xf32, #tpu.memory_space<vmem>>) attributes {dimension_semantics = [#tpu.dimension_semantics<parallel>], iteration_bounds = array<i64: 1>, scalar_prefetch = 0 : i64, scratch_operands = 0 : i64, tpu.core_type = #tpu.core_type<tc>, window_params = [{transform_indices = @transform_0, window_bounds = array<i64: 256, 4>}, {pipeline_mode = #tpu.pipeline_mode<synchronous>, transform_indices = @transform_1, window_bounds = array<i64: 128, 32>}, {transform_indices = @transform_2, window_bounds = array<i64: 256, 32>}]} {
    %c0 = arith.constant 0 : index
    %c0_0 = arith.constant 0 : index
    %0 = vector.load %arg1[%c0, %c0_0] : memref<256x4xi32, #tpu.memory_space<vmem>>, vector<256x4xi32>
    %c0_i32 = arith.constant 0 : i32
    %1 = vector.broadcast %c0_i32 : i32 to vector<256x4xi32>
    %2 = arith.cmpi ne, %0, %1 : vector<256x4xi32>
    %3 = arith.extui %2 : vector<256x4xi1> to vector<256x4xi32>
    %4 = arith.sitofp %3 : vector<256x4xi32> to vector<256x4xf32>
    %cst = arith.constant dense<0.000000e+00> : vector<256xf32>
    %5 = vector.multi_reduction <add>, %4, %cst [1] : vector<256x4xf32> to vector<256xf32>
    %6 = vector.shape_cast %5 : vector<256xf32> to vector<256x1xf32>
    %cst_1 = arith.constant 9.99999971E-10 : f32
    %7 = vector.broadcast %cst_1 : f32 to vector<256x1xf32>
    %8 = arith.addf %6, %7 : vector<256x1xf32>
    %9 = vector.broadcast %8 : vector<256x1xf32> to vector<256x4xf32>
    %10 = arith.divf %4, %9 : vector<256x4xf32>
    %11 = tpu.iota {dimensions = array<i32: 1>} : vector<1x128xi32>
    %cst_2 = arith.constant 0.000000e+00 : f32
    %12 = vector.broadcast %cst_2 : f32 to vector<256x128xf32>
    %13 = vector.extract_strided_slice %0 {offsets = [0, 0], sizes = [256, 1], strides = [1, 1]} : vector<256x4xi32> to vector<256x1xi32>
    %14 = vector.extract_strided_slice %10 {offsets = [0, 0], sizes = [256, 1], strides = [1, 1]} : vector<256x4xf32> to vector<256x1xf32>
    %15 = vector.broadcast %11 : vector<1x128xi32> to vector<256x128xi32>
    %16 = vector.broadcast %13 : vector<256x1xi32> to vector<256x128xi32>
    %17 = arith.cmpi eq, %15, %16 : vector<256x128xi32>
    %cst_3 = arith.constant 0.000000e+00 : f32
    %18 = vector.shape_cast %14 : vector<256x1xf32> to vector<256x1xf32>
    %19 = vector.broadcast %18 : vector<256x1xf32> to vector<256x128xf32>
    %20 = vector.broadcast %cst_3 : f32 to vector<256x128xf32>
    %21 = arith.select %17, %19, %20 : vector<256x128xi1>, vector<256x128xf32>
    %22 = arith.addf %12, %21 : vector<256x128xf32>
    %23 = vector.extract_strided_slice %0 {offsets = [0, 1], sizes = [256, 1], strides = [1, 1]} : vector<256x4xi32> to vector<256x1xi32>
    %24 = vector.extract_strided_slice %10 {offsets = [0, 1], sizes = [256, 1], strides = [1, 1]} : vector<256x4xf32> to vector<256x1xf32>
    %25 = vector.broadcast %11 : vector<1x128xi32> to vector<256x128xi32>
    %26 = vector.broadcast %23 : vector<256x1xi32> to vector<256x128xi32>
    %27 = arith.cmpi eq, %25, %26 : vector<256x128xi32>
    %cst_4 = arith.constant 0.000000e+00 : f32
    %28 = vector.shape_cast %24 : vector<256x1xf32> to vector<256x1xf32>
    %29 = vector.broadcast %28 : vector<256x1xf32> to vector<256x128xf32>
    %30 = vector.broadcast %cst_4 : f32 to vector<256x128xf32>
    %31 = arith.select %27, %29, %30 : vector<256x128xi1>, vector<256x128xf32>
    %32 = arith.addf %22, %31 : vector<256x128xf32>
    %33 = vector.extract_strided_slice %0 {offsets = [0, 2], sizes = [256, 1], strides = [1, 1]} : vector<256x4xi32> to vector<256x1xi32>
    %34 = vector.extract_strided_slice %10 {offsets = [0, 2], sizes = [256, 1], strides = [1, 1]} : vector<256x4xf32> to vector<256x1xf32>
    %35 = vector.broadcast %11 : vector<1x128xi32> to vector<256x128xi32>
    %36 = vector.broadcast %33 : vector<256x1xi32> to vector<256x128xi32>
    %37 = arith.cmpi eq, %35, %36 : vector<256x128xi32>
    %cst_5 = arith.constant 0.000000e+00 : f32
    %38 = vector.shape_cast %34 : vector<256x1xf32> to vector<256x1xf32>
    %39 = vector.broadcast %38 : vector<256x1xf32> to vector<256x128xf32>
    %40 = vector.broadcast %cst_5 : f32 to vector<256x128xf32>
    %41 = arith.select %37, %39, %40 : vector<256x128xi1>, vector<256x128xf32>
    %42 = arith.addf %32, %41 : vector<256x128xf32>
    %43 = vector.extract_strided_slice %0 {offsets = [0, 3], sizes = [256, 1], strides = [1, 1]} : vector<256x4xi32> to vector<256x1xi32>
    %44 = vector.extract_strided_slice %10 {offsets = [0, 3], sizes = [256, 1], strides = [1, 1]} : vector<256x4xf32> to vector<256x1xf32>
    %45 = vector.broadcast %11 : vector<1x128xi32> to vector<256x128xi32>
    %46 = vector.broadcast %43 : vector<256x1xi32> to vector<256x128xi32>
    %47 = arith.cmpi eq, %45, %46 : vector<256x128xi32>
    %cst_6 = arith.constant 0.000000e+00 : f32
    %48 = vector.shape_cast %44 : vector<256x1xf32> to vector<256x1xf32>
    %49 = vector.broadcast %48 : vector<256x1xf32> to vector<256x128xf32>
    %50 = vector.broadcast %cst_6 : f32 to vector<256x128xf32>
    %51 = arith.select %47, %49, %50 : vector<256x128xi1>, vector<256x128xf32>
    %52 = arith.addf %42, %51 : vector<256x128xf32>
    %c0_7 = arith.constant 0 : index
    %c0_8 = arith.constant 0 : index
    %53 = vector.load %arg2[%c0_7, %c0_8] : memref<128x32xf32, #tpu.memory_space<vmem>>, vector<128x32xf32>
    %cst_9 = arith.constant dense<0.000000e+00> : vector<256x32xf32>
    %54 = tpu.matmul %52, %53, %cst_9 {dimension_numbers = #tpu.dot_dimension_numbers<[1], [0], [0], [1], [0, 0, 1, 1], [], []>} : vector<256x128xf32>, vector<128x32xf32>, vector<256x32xf32> -> vector<256x32xf32>
    %c0_10 = arith.constant 0 : index
    %c0_11 = arith.constant 0 : index
    %55 = vector.load %arg3[%c0_10, %c0_11] : memref<256x32xf32, #tpu.memory_space<vmem>>, vector<256x32xf32>
    tpu.vector_store %arg3[%c0_10, %c0_11], %54 {strides = array<i32>} : memref<256x32xf32, #tpu.memory_space<vmem>>, vector<256x32xf32>,
    return
  }
  func.func @transform_0(%arg0: i32) -> (i32, i32) {
    %c0_i32 = arith.constant 0 : i32
    %c0_i32_0 = arith.constant 0 : i32
    return %arg0, %c0_i32 : i32, i32
  }
  func.func @transform_1(%arg0: i32) -> (i32, i32) {
    %c0_i32 = arith.constant 0 : i32
    %c0_i32_0 = arith.constant 0 : i32
    %c0_i32_1 = arith.constant 0 : i32
    return %c0_i32, %c0_i32_0 : i32, i32
  }
  func.func @transform_2(%arg0: i32) -> (i32, i32) {
    %c0_i32 = arith.constant 0 : i32
    %c0_i32_0 = arith.constant 0 : i32
    return %arg0, %c0_i32 : i32, i32
  }
}

</mosaic_0001>

<bundles_post_ra>
// kernel: subtoken_embeddings.1
= control target key start
LH: loop header
LB: loop body
LE: loop exit
PB: predicated region body
PF: predicated region fallthrough
CT: control target
= control target key end

     0   :  { %vm139_vm0 = vcmask 31744   ;;  %v2255_v3 = vmov 0   ;;  %v3952_v7 = vmov 0.0   ;;  %s3949_s0 = inlined_call_operand.vmem [shape: s32[256,4], index: 0, kind: input, shape index: {}]   ;;  %s3950_s1 = inlined_call_operand.vmem [shape: f32[128,32], index: 1, kind: input, shape index: {}]   ;;  %s3951_s2 = inlined_call_operand.vmem [shape: f32[256,32], index: 2, kind: output, shape index: {}]  }
   0x1   :  { %v2278_v0 = vld [vmem:[%s3949_s0 + $0x10] sm:$0xff]  ;;  %v2283_v1 = vld [vmem:[%s3949_s0] sm:$0xff]  ;;  %v2288_v2 = vld [vmem:[%s3949_s0 + $0x18] sm:$0xff]  ;;  %2138 = vset.pattern.permute.xlu1 %v2255_v3  ;;  %2137 = vset.pattern.permute.xlu0 %v2255_v3 }
   0x2   :  { %vm45_vm1 = vcmp.ne.s32.totalorder %v2278_v0, 0  ;;  %vm43_vm2 = vcmp.ne.s32.totalorder %v2283_v1, 0  ;;  %vm46_vm3 = vcmp.ne.s32.totalorder %v2288_v2, 0  ;;  %v2296_v4 = vld [vmem:[%s3949_s0 + $0x8] sm:$0xff]  ;;  %v2306_v6 = vld [vmem:[%s3949_s0 + $0x20] sm:$0xff]  ;;  %v2330_v14 = vld [vmem:[%s3949_s0 + $0x38] sm:$0xff] }
   0x3   :  { %v2301_v5 = vld [vmem:[%s3949_s0 + $0x28] sm:$0xff]  ;;  %v2309_v8 = vsel %vm45_vm1, 1.0, %v3952_v7  ;;  %v2312_v9 = vsel %vm43_vm2, 1.0, %v3952_v7  ;;  %v2315_v10 = vsel %vm46_vm3, 1.0, %v3952_v7  ;;  %vm44_vm4 = vcmp.ne.s32.totalorder %v2296_v4, 0  ;;  %v2335_v15 = vld [vmem:[%s3949_s0 + $0x30] sm:$0xff] }
   0x4   :  { %v146_v11 = vsel %vm139_vm0, %v2309_v8, 0.0  ;;  %v140_v12 = vsel %vm139_vm0, %v2312_v9, 0.0  ;;  %v2323_v13 = vsel %vm44_vm4, 1.0, %v3952_v7  ;;  %vm48_vm5 = vcmp.ne.s32.totalorder %v2301_v5, 0  ;;  %v2352_v20 = vld [vmem:[%s3949_s0 + $0x48] sm:$0xff]  ;;  %v2357_v21 = vld [vmem:[%s3949_s0 + $0x40] sm:$0xff] }
   0x5   :  { %147 = vadd.xlane.f32.xlu1 %v146_v11  ;;  %141 = vadd.xlane.f32.xlu0 %v140_v12  ;;  %vm47_vm6 = vcmp.ne.s32.totalorder %v2306_v6, 0  ;;  %v149_v16 = vsel %vm139_vm0, %v2315_v10, 0.0  ;;  %v143_v17 = vsel %vm139_vm0, %v2323_v13, 0.0  ;;  %v2342_v18 = vsel %vm48_vm5, 1.0, %v3952_v7  ;;  %v2374_v26 = vld [vmem:[%s3949_s0 + $0x58] sm:$0xff]  ;;  %v2379_v27 = vld [vmem:[%s3949_s0 + $0x50] sm:$0xff] }
   0x6   :  { %v2345_v19 = vsel %vm47_vm6, 1.0, %v3952_v7  ;;  %vm50_vm7 = vcmp.ne.s32.totalorder %v2330_v14, 0  ;;  %vm49_vm8 = vcmp.ne.s32.totalorder %v2335_v15, 0  ;;  %v155_v22 = vsel %vm139_vm0, %v2342_v18, 0.0  ;;  %v2396_v32 = vld [vmem:[%s3949_s0 + $0x68] sm:$0xff]  ;;  %v2401_v33 = vld [vmem:[%s3949_s0 + $0x60] sm:$0xff] }
   0x7   :  { %v152_v23 = vsel %vm139_vm0, %v2345_v19, 0.0  ;;  %v2364_v24 = vsel %vm50_vm7, 1.0, %v3952_v7  ;;  %v2367_v25 = vsel %vm49_vm8, 1.0, %v3952_v7  ;;  %vm52_vm9 = vcmp.ne.s32.totalorder %v2352_v20, 0  ;;  %v2418_v38 = vld [vmem:[%s3949_s0 + $0x78] sm:$0xff]  ;;  %v2423_v39 = vld [vmem:[%s3949_s0 + $0x70] sm:$0xff] }
   0x8   :  { %vm51_vm10 = vcmp.ne.s32.totalorder %v2357_v21, 0  ;;  %v161_v28 = vsel %vm139_vm0, %v2364_v24, 0.0  ;;  %v158_v29 = vsel %vm139_vm0, %v2367_v25, 0.0  ;;  %v2386_v30 = vsel %vm52_vm9, 1.0, %v3952_v7  ;;  %v2440_v44 = vld [vmem:[%s3949_s0 + $0x88] sm:$0xff]  ;;  %v2445_v45 = vld [vmem:[%s3949_s0 + $0x80] sm:$0xff] }
   0x9   :  { %150 = vadd.xlane.f32.xlu1 %v149_v16  ;;  %144 = vadd.xlane.f32.xlu0 %v143_v17  ;;  %v2389_v31 = vsel %vm51_vm10, 1.0, %v3952_v7  ;;  %vm54_vm11 = vcmp.ne.s32.totalorder %v2374_v26, 0  ;;  %vm53_vm12 = vcmp.ne.s32.totalorder %v2379_v27, 0  ;;  %v167_v34 = vsel %vm139_vm0, %v2386_v30, 0.0  ;;  %v2462_v50 = vld [vmem:[%s3949_s0 + $0x98] sm:$0xff]  ;;  %v2467_v51 = vld [vmem:[%s3949_s0 + $0x90] sm:$0xff] }
   0xa   :  { %v164_v35 = vsel %vm139_vm0, %v2389_v31, 0.0  ;;  %v2408_v36 = vsel %vm54_vm11, 1.0, %v3952_v7  ;;  %v2411_v37 = vsel %vm53_vm12, 1.0, %v3952_v7  ;;  %vm56_vm13 = vcmp.ne.s32.totalorder %v2396_v32, 0  ;;  %v2484_v56 = vld [vmem:[%s3949_s0 + $0xa8] sm:$0xff]  ;;  %v2489_v57 = vld [vmem:[%s3949_s0 + $0xa0] sm:$0xff] }
   0xb   :  { %vm55_vm14 = vcmp.ne.s32.totalorder %v2401_v33, 0  ;;  %v173_v40 = vsel %vm139_vm0, %v2408_v36, 0.0  ;;  %v170_v41 = vsel %vm139_vm0, %v2411_v37, 0.0  ;;  %v2430_v42 = vsel %vm56_vm13, 1.0, %v3952_v7  ;;  %3994 = vst [vmem:[#allocation2_spill] sm:$0xff] %v2484_v56  ;;  %v2506_v62 = vld [vmem:[%s3949_s0 + $0xb8] sm:$0xff] }
   0xc   :  { %v2433_v43 = vsel %vm55_vm14, 1.0, %v3952_v7  ;;  %vm58_vm15 = vcmp.ne.s32.totalorder %v2418_v38, 0  ;;  %vm57_vm1 = vcmp.ne.s32.totalorder %v2423_v39, 0  ;;  %v179_v46 = vsel %vm139_vm0, %v2430_v42, 0.0  ;;  %3995 = vst [vmem:[#allocation3_spill] sm:$0xff] %v2506_v62  ;;  %v2511_v63 = vld [vmem:[%s3949_s0 + $0xb0] sm:$0xff] }
   0xd   :  { %156 = vadd.xlane.f32.xlu1 %v155_v22  ;;  %153 = vadd.xlane.f32.xlu0 %v152_v23  ;;  %v176_v47 = vsel %vm139_vm0, %v2433_v43, 0.0  ;;  %v2452_v48 = vsel %vm58_vm15, 1.0, %v3952_v7  ;;  %v2455_v49 = vsel %vm57_vm1, 1.0, %v3952_v7  ;;  %vm60_vm2 = vcmp.ne.s32.totalorder %v2440_v44, 0  ;;  %v2528_v17 = vld [vmem:[%s3949_s0 + $0xc8] sm:$0xff]  ;;  %v2533_v22 = vld [vmem:[%s3949_s0 + $0xc0] sm:$0xff] }
   0xe   :  { %vm59_vm3 = vcmp.ne.s32.totalorder %v2445_v45, 0  ;;  %v185_v52 = vsel %vm139_vm0, %v2452_v48, 0.0  ;;  %v182_v53 = vsel %vm139_vm0, %v2455_v49, 0.0  ;;  %v2474_v54 = vsel %vm60_vm2, 1.0, %v3952_v7  ;;  %3996 = vst [vmem:[#allocation4_spill] sm:$0xff] %v2528_v17  ;;  %3997 = vst [vmem:[#allocation5_spill] sm:$0xff] %v2533_v22 }
   0xf   :  { %v2477_v55 = vsel %vm59_vm3, 1.0, %v3952_v7  ;;  %vm62_vm4 = vcmp.ne.s32.totalorder %v2462_v50, 0  ;;  %vm61_vm5 = vcmp.ne.s32.totalorder %v2467_v51, 0  ;;  %v191_v58 = vsel %vm139_vm0, %v2474_v54, 0.0 }
  0x10   :  { %v188_v59 = vsel %vm139_vm0, %v2477_v55, 0.0  ;;  %v2496_v60 = vsel %vm62_vm4, 1.0, %v3952_v7  ;;  %v2499_v61 = vsel %vm61_vm5, 1.0, %v3952_v7  ;;  %vm64_vm6 = vcmp.ne.s32.totalorder %v2484_v56, 0 }
  0x11   :  { %162 = vadd.xlane.f32.xlu1 %v161_v28  ;;  %159 = vadd.xlane.f32.xlu0 %v158_v29  ;;  %vm63_vm7 = vcmp.ne.s32.totalorder %v2489_v57, 0  ;;  %v197_v3 = vsel %vm139_vm0, %v2496_v60, 0.0  ;;  %v194_v11 = vsel %vm139_vm0, %v2499_v61, 0.0  ;;  %v2518_v12 = vsel %vm64_vm6, 1.0, %v3952_v7 }
  0x12   :  { %v2521_v16 = vsel %vm63_vm7, 1.0, %v3952_v7  ;;  %vm66_vm8 = vcmp.ne.s32.totalorder %v2506_v62, 0  ;;  %vm65_vm9 = vcmp.ne.s32.totalorder %v2511_v63, 0  ;;  %v203_v23 = vsel %vm139_vm0, %v2518_v12, 0.0 }
  0x13   :  { %v200_v28 = vsel %vm139_vm0, %v2521_v16, 0.0  ;;  %v2540_v29 = vsel %vm66_vm8, 1.0, %v3952_v7  ;;  %vm68_vm10 = vcmp.ne.s32.totalorder %v2528_v17, 0  ;;  %vm67_vm11 = vcmp.ne.s32.totalorder %v2533_v22, 0 }
  0x14   :  { %3998 = vst [vmem:[#allocation6_spill] sm:$0xff] %v2540_v29 }
  0x15   :  { %168 = vadd.xlane.f32.xlu1 %v167_v34  ;;  %165 = vadd.xlane.f32.xlu0 %v164_v35  ;;  %v2543_v34 = vsel %vm65_vm9, 1.0, %v3952_v7  ;;  %v2550_v35 = vld [vmem:[%s3949_s0 + $0xd8] sm:$0xff] }
  0x16   :  { %3999 = vst [vmem:[#allocation7_spill] sm:$0xff] %v2543_v34  ;;  %4000 = vst [vmem:[#allocation8_spill] sm:$0xff] %v2550_v35  ;;  %vm70_vm12 = vcmp.ne.s32.totalorder %v2550_v35, 0 }
  0x19   :  { %174 = vadd.xlane.f32.xlu1 %v173_v40  ;;  %171 = vadd.xlane.f32.xlu0 %v170_v41  ;;  %v2555_v40 = vld [vmem:[%s3949_s0 + $0xd0] sm:$0xff]  ;;  %v209_v41 = vsel %vm139_vm0, %v2540_v29, 0.0 }
  0x1a   :  { %4001 = vst [vmem:[#allocation9_spill] sm:$0xff] %v2555_v40  ;;  %vm69_vm13 = vcmp.ne.s32.totalorder %v2555_v40, 0 }
  0x1d   :  { %180 = vadd.xlane.f32.xlu1 %v179_v46  ;;  %177 = vadd.xlane.f32.xlu0 %v176_v47  ;;  %v206_v46 = vsel %vm139_vm0, %v2543_v34, 0.0  ;;  %v2562_v47 = vsel %vm68_vm10, 1.0, %v3952_v7 }
  0x1e   :  { %4002 = vst [vmem:[#allocation10_spill] sm:$0xff] %v2562_v47 }
  0x21   :  { %186 = vadd.xlane.f32.xlu1 %v185_v52  ;;  %183 = vadd.xlane.f32.xlu0 %v182_v53  ;;  %v2565_v52 = vsel %vm67_vm11, 1.0, %v3952_v7  ;;  %v2572_v53 = vld [vmem:[%s3949_s0 + $0xe8] sm:$0xff] }
  0x22   :  { %4003 = vst [vmem:[#allocation11_spill] sm:$0xff] %v2565_v52  ;;  %4004 = vst [vmem:[#allocation12_spill] sm:$0xff] %v2572_v53  ;;  %vm72_vm14 = vcmp.ne.s32.totalorder %v2572_v53, 0 }
  0x25   :  { %192 = vadd.xlane.f32.xlu1 %v191_v58  ;;  %189 = vadd.xlane.f32.xlu0 %v188_v59  ;;  %v2577_v58 = vld [vmem:[%s3949_s0 + $0xe0] sm:$0xff]  ;;  %v215_v59 = vsel %vm139_vm0, %v2562_v47, 0.0  ;;  %v4009_v47 = vmov 0.0  }
  0x26   :  { %vm71_vm15 = vcmp.ne.s32.totalorder %v2577_v58, 0 }
  0x29   :  { %198 = vadd.xlane.f32.xlu1 %v197_v3  ;;  %195 = vadd.xlane.f32.xlu0 %v194_v11  ;;  %v212_v3 = vsel %vm139_vm0, %v2565_v52, 0.0  ;;  %v2584_v11 = vsel %vm70_vm12, 1.0, %v3952_v7  ;;  %v2606_v52 = vsel %vm72_vm14, 1.0, %v4009_v47 }
  0x2a   :  { %4005 = vst [vmem:[#allocation13_spill] sm:$0xff] %v2584_v11 }
  0x2d   :  { %204 = vadd.xlane.f32.xlu1 %v203_v23  ;;  %201 = vadd.xlane.f32.xlu0 %v200_v28  ;;  %v2587_v23 = vsel %vm69_vm13, 1.0, %v3952_v7  ;;  %v2594_v28 = vld [vmem:[%s3949_s0 + $0xf8] sm:$0xff] }
  0x2e   :  { %4006 = vst [vmem:[#allocation14_spill] sm:$0xff] %v2587_v23  ;;  %4007 = vst [vmem:[#allocation15_spill] sm:$0xff] %v2594_v28  ;;  %v218_v7 = vsel %vm139_vm0, %v2587_v23, 0.0  ;;  %vm74_vm1 = vcmp.ne.s32.totalorder %v2594_v28, 0 }
  0x2f   :  { %v2618_v23 = vsel %vm74_vm1, 1.0, %v4009_v47 }
  0x30   :  { %v233_v34 = vsel %vm139_vm0, %v2618_v23, 0.0 }
  0x31   :  { %210 = vadd.xlane.f32.xlu1 %v209_v41  ;;  %207 = vadd.xlane.f32.xlu0 %v206_v46  ;;  %v2599_v41 = vld [vmem:[%s3949_s0 + $0xf0] sm:$0xff]  ;;  %v221_v46 = vsel %vm139_vm0, %v2584_v11, 0.0 }
  0x32   :  { %4008 = vst [vmem:[#allocation16_spill] sm:$0xff] %v2599_v41  ;;  %vm73_vm2 = vcmp.ne.s32.totalorder %v2599_v41, 0 }
  0x33   :  { %v2621_v29 = vsel %vm73_vm2, 1.0, %v4009_v47 }
  0x35   :  { %216 = vadd.xlane.f32.xlu1 %v215_v59  ;;  %213 = vadd.xlane.f32.xlu0 %v212_v3  ;;  %v2609_v59 = vsel %vm71_vm15, 1.0, %v4009_v47  ;;  %v227_v3 = vsel %vm139_vm0, %v2606_v52, 0.0 }
  0x36   :  { %v224_v11 = vsel %vm139_vm0, %v2609_v59, 0.0 }
  0x39   :  { %222 = vadd.xlane.f32.xlu1 %v221_v46  ;;  %219 = vadd.xlane.f32.xlu0 %v218_v7  ;;  %v230_v7 = vsel %vm139_vm0, %v2621_v29, 0.0 }
  0x3d   :  { %228 = vadd.xlane.f32.xlu1 %v227_v3  ;;  %225 = vadd.xlane.f32.xlu0 %v224_v11 }
  0x41   :  { %234 = vadd.xlane.f32.xlu1 %v233_v34  ;;  %231 = vadd.xlane.f32.xlu0 %v230_v7 }
  0x52   :  { %338 = vperm.xlu1 %2138, %v2296_v4  }
  0x56   :  { %341 = vperm.xlu1 %2138, %v2278_v0  }
  0x57   :  { %335 = vperm.xlu0 %2137, %v2283_v1  }
  0x5a   :  { %344 = vperm.xlu1 %2138, %v2288_v2  }
  0x5b   :  { %362 = vperm.xlu0 %2137, %v2352_v20  }
  0x5e   :  { %347 = vperm.xlu1 %2138, %v2306_v6  }
  0x5f   :  { %368 = vperm.xlu0 %2137, %v2374_v26  }
  0x62   :  { %350 = vperm.xlu1 %2138, %v2301_v5  }
  0x63   :  { %374 = vperm.xlu0 %2137, %v2396_v32  }
  0x66   :  { %353 = vperm.xlu1 %2138, %v2335_v15  }
  0x67   :  { %380 = vperm.xlu0 %2137, %v2418_v38  }
  0x6a   :  { %356 = vperm.xlu1 %2138, %v2330_v14  }
  0x6b   :  { %386 = vperm.xlu0 %2137, %v2440_v44  }
  0x6e   :  { %359 = vperm.xlu1 %2138, %v2357_v21  }
  0x6f   :  { %392 = vperm.xlu0 %2137, %v2462_v50  }
  0x72   :  { %365 = vperm.xlu1 %2138, %v2379_v27  }
  0x73   :  { %398 = vperm.xlu0 %2137, %v2484_v56  }
  0x76   :  { %371 = vperm.xlu1 %2138, %v2401_v33  }
  0x77   :  { %404 = vperm.xlu0 %2137, %v2506_v62  }
  0x7a   :  { %377 = vperm.xlu1 %2138, %v2423_v39  }
  0x7b   :  { %410 = vperm.xlu0 %2137, %v2528_v17  }
  0x7e   :  { %383 = vperm.xlu1 %2138, %v2445_v45  }
  0x7f   :  { %416 = vperm.xlu0 %2137, %v2550_v35  }
  0x82   :  { %389 = vperm.xlu1 %2138, %v2467_v51  }
  0x83   :  { %422 = vperm.xlu0 %2137, %v2572_v53  }
  0x86   :  { %395 = vperm.xlu1 %2138, %v2489_v57  }
  0x87   :  { %428 = vperm.xlu0 %2137, %v2594_v28  }
  0x8a   :  { %401 = vperm.xlu1 %2138, %v2511_v63  }
  0x8e   :  { %407 = vperm.xlu1 %2138, %v2533_v22  }
  0x92   :  { %v148_v34 = vpop.xlane.xlu1 %147  ;;  %413 = vperm.xlu1 %2138, %v2555_v40   ;;  %v142_v47 = vpop.xlane.xlu0 %141 }
  0x93   :  { %v238_v11 = vadd.f32 1e-09, %v148_v34  ;;  %v236_v46 = vadd.f32 1e-09, %v142_v47 }
  0x95   :  { %2159 = vrcp.f32 %v238_v11 }
  0x96   :  { %2161 = vrcp.f32 %v236_v46  ;;  %v151_v3 = vpop.xlane.xlu1 %150  ;;  %419 = vperm.xlu1 %2138, %v2577_v58   ;;  %v145_v7 = vpop.xlane.xlu0 %144 }
  0x97   :  { %v239_v53 = vadd.f32 1e-09, %v151_v3  ;;  %v237_v35 = vadd.f32 1e-09, %v145_v7 }
  0x99   :  { %2163 = vrcp.f32 %v239_v53 }
  0x9a   :  { %2165 = vrcp.f32 %v237_v35  ;;  %v157_v28 = vpop.xlane.xlu1 %156  ;;  %425 = vperm.xlu1 %2138, %v2599_v41   ;;  %v154_v17 = vpop.xlane.xlu0 %153 }
  0x9b   :  { %v241_v62 = vadd.f32 1e-09, %v157_v28  ;;  %v240_v22 = vadd.f32 1e-09, %v154_v17 }
  0x9d   :  { %2167 = vrcp.f32 %v241_v62 }
  0x9e   :  { %2169 = vrcp.f32 %v240_v22  ;;  %v163_v34 = vpop.xlane.xlu1 %162  ;;  %v160_v47 = vpop.xlane.xlu0 %159 }
  0x9f   :  { %v2160_v11 = vpop.eup %2159  ;;  %v243_v46 = vadd.f32 1e-09, %v163_v34  ;;  %v242_v40 = vadd.f32 1e-09, %v160_v47 }
  0xa0   :  { %v2162_v56 = vpop.eup %2161  ;;  %v2664_v62 = vmul.f32 %v2160_v11, %v2309_v8 }
  0xa1   :  { %2171 = vrcp.f32 %v243_v46  ;;  %v2660_v3 = vmul.f32 %v2162_v56, %v2312_v9 }
  0xa2   :  { %2173 = vrcp.f32 %v242_v40  ;;  %v169_v35 = vpop.xlane.xlu1 %168  ;;  %v166_v53 = vpop.xlane.xlu0 %165 }
  0xa3   :  { %v2164_v7 = vpop.eup %2163  ;;  %v245_v41 = vadd.f32 1e-09, %v169_v35  ;;  %464 = vperm.xlu1 %2138, %v2660_v3   ;;  %v244_v17 = vadd.f32 1e-09, %v166_v53 }
  0xa4   :  { %v2166_v22 = vpop.eup %2165  ;;  %v2672_v46 = vmul.f32 %v2164_v7, %v2315_v10 }
  0xa5   :  { %2175 = vrcp.f32 %v245_v41  ;;  %v2667_v28 = vmul.f32 %v2166_v22, %v2323_v13 }
  0xa6   :  { %2177 = vrcp.f32 %v244_v17  ;;  %v175_v34 = vpop.xlane.xlu1 %174  ;;  %v172_v9 = vpop.xlane.xlu0 %171 }
  0xa7   :  { %v2168_v56 = vpop.eup %2167  ;;  %v247_v40 = vadd.f32 1e-09, %v175_v34  ;;  %474 = vperm.xlu1 %2138, %v2664_v62   ;;  %469 = vperm.xlu0 %2137, %v2667_v28   ;;  %v246_v47 = vadd.f32 1e-09, %v172_v9 }
  0xa8   :  { %v2170_v8 = vpop.eup %2169  ;;  %v2680_v22 = vmul.f32 %v2168_v56, %v2342_v18 }
  0xa9   :  { %2179 = vrcp.f32 %v247_v40  ;;  %v2675_v41 = vmul.f32 %v2170_v8, %v2345_v19 }
  0xaa   :  { %2181 = vrcp.f32 %v246_v47  ;;  %v181_v13 = vpop.xlane.xlu1 %180  ;;  %v178_v11 = vpop.xlane.xlu0 %177 }
  0xab   :  { %v2172_v35 = vpop.eup %2171  ;;  %v249_v53 = vadd.f32 1e-09, %v181_v13  ;;  %479 = vperm.xlu0 %2137, %v2672_v46   ;;  %484 = vperm.xlu1 %2138, %v2675_v41   ;;  %v248_v17 = vadd.f32 1e-09, %v178_v11 }
  0xac   :  { %v2174_v10 = vpop.eup %2173  ;;  %v2688_v8 = vmul.f32 %v2172_v35, %v2364_v24 }
  0xad   :  { %2183 = vrcp.f32 %v249_v53  ;;  %v2683_v7 = vmul.f32 %v2174_v10, %v2367_v25 }
  0xae   :  { %2185 = vrcp.f32 %v248_v17  ;;  %v187_v19 = vpop.xlane.xlu1 %186  ;;  %v184_v34 = vpop.xlane.xlu0 %183 }
  0xaf   :  { %v2176_v9 = vpop.eup %2175  ;;  %v251_v40 = vadd.f32 1e-09, %v187_v19  ;;  %489 = vperm.xlu0 %2137, %v2680_v22   ;;  %494 = vperm.xlu1 %2138, %v2683_v7   ;;  %v250_v47 = vadd.f32 1e-09, %v184_v34 }
  0xb0   :  { %v2178_v18 = vpop.eup %2177  ;;  %v2696_v10 = vmul.f32 %v2176_v9, %v2386_v30 }
  0xb1   :  { %2187 = vrcp.f32 %v251_v40  ;;  %v2691_v56 = vmul.f32 %v2178_v18, %v2389_v31 }
  0xb2   :  { %2189 = vrcp.f32 %v250_v47  ;;  %v193_v25 = vpop.xlane.xlu1 %192  ;;  %v190_v13 = vpop.xlane.xlu0 %189 }
  0xb3   :  { %v2180_v11 = vpop.eup %2179  ;;  %v253_v53 = vadd.f32 1e-09, %v193_v25  ;;  %499 = vperm.xlu0 %2137, %v2688_v8   ;;  %504 = vperm.xlu1 %2138, %v2691_v56   ;;  %v252_v17 = vadd.f32 1e-09, %v190_v13 }
  0xb4   :  { %v2182_v24 = vpop.eup %2181  ;;  %v2704_v18 = vmul.f32 %v2180_v11, %v2408_v36 }
  0xb5   :  { %2191 = vrcp.f32 %v253_v53  ;;  %v2699_v35 = vmul.f32 %v2182_v24, %v2411_v37 }
  0xb6   :  { %2193 = vrcp.f32 %v252_v17  ;;  %v199_v31 = vpop.xlane.xlu1 %198  ;;  %v196_v19 = vpop.xlane.xlu0 %195 }
  0xb7   :  { %v2184_v34 = vpop.eup %2183  ;;  %v255_v40 = vadd.f32 1e-09, %v199_v31  ;;  %509 = vperm.xlu0 %2137, %v2696_v10   ;;  %514 = vperm.xlu1 %2138, %v2699_v35   ;;  %v254_v47 = vadd.f32 1e-09, %v196_v19 }
  0xb8   :  { %v2186_v30 = vpop.eup %2185  ;;  %v2712_v24 = vmul.f32 %v2184_v34, %v2430_v42 }
  0xb9   :  { %2195 = vrcp.f32 %v255_v40  ;;  %v2707_v9 = vmul.f32 %v2186_v30, %v2433_v43 }
  0xba   :  { %2197 = vrcp.f32 %v254_v47  ;;  %v205_v37 = vpop.xlane.xlu1 %204  ;;  %v202_v25 = vpop.xlane.xlu0 %201 }
  0xbb   :  { %v2188_v13 = vpop.eup %2187  ;;  %v257_v53 = vadd.f32 1e-09, %v205_v37  ;;  %519 = vperm.xlu0 %2137, %v2704_v18   ;;  %524 = vperm.xlu1 %2138, %v2707_v9   ;;  %v256_v17 = vadd.f32 1e-09, %v202_v25 }
  0xbc   :  { %v2190_v36 = vpop.eup %2189  ;;  %v2720_v30 = vmul.f32 %v2188_v13, %v2452_v48 }
  0xbd   :  { %2199 = vrcp.f32 %v257_v53  ;;  %v2715_v11 = vmul.f32 %v2190_v36, %v2455_v49 }
  0xbe   :  { %2201 = vrcp.f32 %v256_v17  ;;  %v211_v43 = vpop.xlane.xlu1 %210  ;;  %v208_v31 = vpop.xlane.xlu0 %207 }
  0xbf   :  { %v2192_v19 = vpop.eup %2191  ;;  %v259_v40 = vadd.f32 1e-09, %v211_v43  ;;  %529 = vperm.xlu0 %2137, %v2712_v24   ;;  %534 = vperm.xlu1 %2138, %v2715_v11   ;;  %v258_v47 = vadd.f32 1e-09, %v208_v31 }
  0xc0   :  { %v2194_v42 = vpop.eup %2193  ;;  %v2728_v36 = vmul.f32 %v2192_v19, %v2474_v54 }
  0xc1   :  { %2203 = vrcp.f32 %v259_v40  ;;  %v2723_v34 = vmul.f32 %v2194_v42, %v2477_v55 }
  0xc2   :  { %2205 = vrcp.f32 %v258_v47  ;;  %v217_v49 = vpop.xlane.xlu1 %216  ;;  %v214_v37 = vpop.xlane.xlu0 %213 }
  0xc3   :  { %v2196_v25 = vpop.eup %2195  ;;  %v261_v53 = vadd.f32 1e-09, %v217_v49  ;;  %539 = vperm.xlu0 %2137, %v2720_v30   ;;  %544 = vperm.xlu1 %2138, %v2723_v34   ;;  %v260_v17 = vadd.f32 1e-09, %v214_v37 }
  0xc4   :  { %v2198_v48 = vpop.eup %2197  ;;  %v2736_v42 = vmul.f32 %v2196_v25, %v2496_v60  ;;  %v4010_v25 = vld [vmem:[#allocation7_spill] sm:$0xff] }
  0xc5   :  { %2207 = vrcp.f32 %v261_v53  ;;  %v2731_v13 = vmul.f32 %v2198_v48, %v2499_v61 }
  0xc6   :  { %2209 = vrcp.f32 %v260_v17  ;;  %v223_v55 = vpop.xlane.xlu1 %222  ;;  %v220_v43 = vpop.xlane.xlu0 %219 }
  0xc7   :  { %v2200_v31 = vpop.eup %2199  ;;  %v263_v40 = vadd.f32 1e-09, %v223_v55  ;;  %549 = vperm.xlu0 %2137, %v2728_v36   ;;  %554 = vperm.xlu1 %2138, %v2731_v13   ;;  %v262_v47 = vadd.f32 1e-09, %v220_v43 }
  0xc8   :  { %v2202_v54 = vpop.eup %2201  ;;  %v2744_v48 = vmul.f32 %v2200_v31, %v2518_v12  ;;  %v4013_v31 = vld [vmem:[#allocation11_spill] sm:$0xff] }
  0xc9   :  { %2211 = vrcp.f32 %v263_v40  ;;  %v2739_v19 = vmul.f32 %v2202_v54, %v2521_v16 }
  0xca   :  { %2213 = vrcp.f32 %v262_v47  ;;  %v229_v61 = vpop.xlane.xlu1 %228  ;;  %v226_v49 = vpop.xlane.xlu0 %225 }
  0xcb   :  { %v2204_v37 = vpop.eup %2203  ;;  %v265_v53 = vadd.f32 1e-09, %v229_v61  ;;  %559 = vperm.xlu0 %2137, %v2736_v42   ;;  %564 = vperm.xlu1 %2138, %v2739_v19   ;;  %v264_v17 = vadd.f32 1e-09, %v226_v49  ;;  %v4012_v61 = vld [vmem:[#allocation6_spill] sm:$0xff] }
  0xcc   :  { %v2206_v60 = vpop.eup %2205  ;;  %v2752_v49 = vmul.f32 %v2204_v37, %v4012_v61 }
  0xcd   :  { %2215 = vrcp.f32 %v265_v53  ;;  %v2747_v55 = vmul.f32 %v2206_v60, %v4010_v25  ;;  %v4015_v25 = vld [vmem:[#allocation10_spill] sm:$0xff] }
  0xce   :  { %2217 = vrcp.f32 %v264_v17  ;;  %v235_v16 = vpop.xlane.xlu1 %234  ;;  %v232_v43 = vpop.xlane.xlu0 %231 }
  0xcf   :  { %4011 = vst [vmem:[#allocation7_spill] sm:$0xff] %v2747_v55  ;;  %v2208_v40 = vpop.eup %2207  ;;  %v267_v47 = vadd.f32 1e-09, %v235_v16  ;;  %569 = vperm.xlu0 %2137, %v2744_v48   ;;  %574 = vperm.xlu1 %2138, %v2747_v55   ;;  %v266_v54 = vadd.f32 1e-09, %v232_v43  ;;  %v4017_v55 = vld [vmem:[#allocation14_spill] sm:$0xff] }
  0xd0   :  { %v2210_v12 = vpop.eup %2209  ;;  %v2762_v16 = vmul.f32 %v2208_v40, %v4015_v25 }
  0xd1   :  { %2219 = vrcp.f32 %v267_v47  ;;  %v2755_v53 = vmul.f32 %v2210_v12, %v4013_v31 }
  0xd2   :  { %2221 = vrcp.f32 %v266_v54  ;;  %v2757_v60 = vpop.permute.xlu1 %338  ;;  %4016 = vst [vmem:[#allocation11_spill] sm:$0xff] %v2762_v16  ;;  %v4019_v54 = vld [vmem:[#allocation13_spill] sm:$0xff] }
  0xd3   :  { %4014 = vst [vmem:[#allocation6_spill] sm:$0xff] %v2757_v60  ;;  %v2212_v17 = vpop.eup %2211  ;;  %579 = vperm.xlu0 %2137, %v2752_v49   ;;  %584 = vperm.xlu1 %2138, %v2755_v53  }
  0xd4   :  { %v2214_v43 = vpop.eup %2213  ;;  %v2772_v12 = vmul.f32 %v2212_v17, %v4019_v54 }
  0xd5   :  { %v2765_v37 = vmul.f32 %v2214_v43, %v4017_v55 }
  0xd6   :  { %v2767_v61 = vpop.permute.xlu1 %341  ;;  %4020 = vst [vmem:[#allocation14_spill] sm:$0xff] %v2772_v12  ;;  %v2774_v60 = vpop.permute.xlu0 %335 }
  0xd7   :  { %4018 = vst [vmem:[#allocation10_spill] sm:$0xff] %v2767_v61  ;;  %v2216_v47 = vpop.eup %2215  ;;  %589 = vperm.xlu0 %2137, %v2762_v16   ;;  %594 = vperm.xlu1 %2138, %v2765_v37   ;;  %4021 = vst [vmem:[#allocation13_spill] sm:$0xff] %v2774_v60 }
  0xd8   :  { %v2218_v31 = vpop.eup %2217  ;;  %v2784_v43 = vmul.f32 %v2216_v47, %v2606_v52  ;;  %v2257_v52 = vmov 1  }
  0xd9   :  { %v2777_v40 = vmul.f32 %v2218_v31, %v2609_v59 }
  0xda   :  { %v2779_v25 = vpop.permute.xlu1 %344  ;;  %4023 = vst [vmem:[#allocation18_spill] sm:$0xff] %v2784_v43  ;;  %v2791_v60 = vpop.permute.xlu0 %362 }
  0xdb   :  { %4022 = vst [vmem:[#allocation17_spill] sm:$0xff] %v2779_v25  ;;  %v2220_v55 = vpop.eup %2219  ;;  %599 = vperm.xlu0 %2137, %v2772_v12   ;;  %604 = vperm.xlu1 %2138, %v2777_v40   ;;  %4025 = vst [vmem:[#allocation20_spill] sm:$0xff] %v2791_v60  ;;  %v4047_v60 = vld [vmem:[#allocation2_spill] sm:$0xff] }
  0xdc   :  { %v2222_v61 = vpop.eup %2221  ;;  %v2796_v59 = vmul.f32 %v2220_v55, %v2618_v23 }
  0xdd   :  { %v2787_v17 = vmul.f32 %v2222_v61, %v2621_v29 }
  0xde   :  { %v2789_v54 = vpop.permute.xlu1 %347  ;;  %4026 = vst [vmem:[#allocation21_spill] sm:$0xff] %v2796_v59  ;;  %v2802_v29 = vpop.permute.xlu0 %368 }
  0xdf   :  { %4024 = vst [vmem:[#allocation19_spill] sm:$0xff] %v2789_v54  ;;  %609 = vperm.xlu0 %2137, %v2784_v43   ;;  %614 = vperm.xlu1 %2138, %v2787_v17   ;;  %4028 = vst [vmem:[#allocation23_spill] sm:$0xff] %v2802_v29  ;;  %v4059_v54 = vld [vmem:[#allocation12_spill] sm:$0xff] }
  0xe2   :  { %v2798_v31 = vpop.permute.xlu1 %350  ;;  %v2810_v23 = vpop.permute.xlu0 %374 }
  0xe3   :  { %4027 = vst [vmem:[#allocation22_spill] sm:$0xff] %v2798_v31  ;;  %619 = vperm.xlu0 %2137, %v2796_v59   ;;  %2139 = vset.pattern.permute.xlu1 %v2257_v52  ;;  %4031 = vst [vmem:[#allocation26_spill] sm:$0xff] %v2810_v23 }
  0xe4   :  { %687 = vperm.xlu1 %2139, %v2283_v1  }
  0xe6   :  { %v2804_v61 = vpop.permute.xlu1 %353  ;;  %v2818_v1 = vpop.permute.xlu0 %380 }
  0xe7   :  { %4029 = vst [vmem:[#allocation24_spill] sm:$0xff] %v2804_v61  ;;  %2140 = vset.pattern.permute.xlu0 %v2257_v52  ;;  %4033 = vst [vmem:[#allocation28_spill] sm:$0xff] %v2818_v1  ;;  %v4050_v61 = vld [vmem:[#allocation3_spill] sm:$0xff] }
  0xe8   :  { %690 = vperm.xlu0 %2140, %v2296_v4   ;;  %693 = vperm.xlu1 %2139, %v2278_v0  }
  0xea   :  { %v2808_v47 = vpop.permute.xlu1 %356  ;;  %v2826_v4 = vpop.permute.xlu0 %386 }
  0xeb   :  { %4030 = vst [vmem:[#allocation25_spill] sm:$0xff] %v2808_v47  ;;  %4036 = vst [vmem:[#allocation31_spill] sm:$0xff] %v2826_v4  ;;  %v4049_v47 = vld [vmem:[#allocation5_spill] sm:$0xff] }
  0xec   :  { %699 = vperm.xlu0 %2140, %v2306_v6   ;;  %696 = vperm.xlu1 %2139, %v2288_v2  }
  0xee   :  { %v2814_v55 = vpop.permute.xlu1 %359 }
  0xef   :  { %4032 = vst [vmem:[#allocation27_spill] sm:$0xff] %v2814_v55 }
  0xf0   :  { %705 = vperm.xlu0 %2140, %v2335_v15   ;;  %702 = vperm.xlu1 %2139, %v2301_v5   ;;  %v2834_v5 = vpop.permute.xlu0 %392 }
  0xf1   :  { %4038 = vst [vmem:[#allocation33_spill] sm:$0xff] %v2834_v5 }
  0xf2   :  { %v2820_v52 = vpop.permute.xlu1 %365 }
  0xf3   :  { %4034 = vst [vmem:[#allocation29_spill] sm:$0xff] %v2820_v52 }
  0xf4   :  { %711 = vperm.xlu0 %2140, %v2357_v21   ;;  %708 = vperm.xlu1 %2139, %v2330_v14   ;;  %v2842_v1 = vpop.permute.xlu0 %398 }
  0xf5   :  { %4041 = vst [vmem:[#allocation36_spill] sm:$0xff] %v2842_v1  ;;  %v4053_v1 = vld [vmem:[#allocation9_spill] sm:$0xff] }
  0xf6   :  { %v2824_v0 = vpop.permute.xlu1 %371 }
  0xf7   :  { %4035 = vst [vmem:[#allocation30_spill] sm:$0xff] %v2824_v0 }
  0xf8   :  { %717 = vperm.xlu0 %2140, %v2379_v27   ;;  %714 = vperm.xlu1 %2139, %v2352_v20   ;;  %v2850_v23 = vpop.permute.xlu0 %404 }
  0xf9   :  { %4043 = vst [vmem:[#allocation38_spill] sm:$0xff] %v2850_v23 }
  0xfa   :  { %v2830_v2 = vpop.permute.xlu1 %377 }
  0xfb   :  { %4037 = vst [vmem:[#allocation32_spill] sm:$0xff] %v2830_v2 }
  0xfc   :  { %723 = vperm.xlu0 %2140, %v2401_v33   ;;  %720 = vperm.xlu1 %2139, %v2374_v26   ;;  %v2858_v52 = vpop.permute.xlu0 %410 }
  0xfd   :  { %4046 = vst [vmem:[#allocation41_spill] sm:$0xff] %v2858_v52  ;;  %v4056_v52 = vld [vmem:[#allocation8_spill] sm:$0xff] }
  0xfe   :  { %v2836_v6 = vpop.permute.xlu1 %383 }
  0xff   :  { %4039 = vst [vmem:[#allocation34_spill] sm:$0xff] %v2836_v6 }
 0x100   :  { %729 = vperm.xlu0 %2140, %v2423_v39   ;;  %726 = vperm.xlu1 %2139, %v2396_v32   ;;  %v2866_v23 = vpop.permute.xlu0 %416 }
 0x101   :  { %4051 = vst [vmem:[#allocation5_spill] sm:$0xff] %v2866_v23 }
 0x102   :  { %v2840_v15 = vpop.permute.xlu1 %389 }
 0x103   :  { %4040 = vst [vmem:[#allocation35_spill] sm:$0xff] %v2840_v15 }
 0x104   :  { %735 = vperm.xlu0 %2140, %v2445_v45   ;;  %732 = vperm.xlu1 %2139, %v2418_v38  }
 0x106   :  { %v2846_v2 = vpop.permute.xlu1 %395 }
 0x107   :  { %4042 = vst [vmem:[#allocation37_spill] sm:$0xff] %v2846_v2  ;;  %v4054_v2 = vld [vmem:[#allocation4_spill] sm:$0xff] }
 0x108   :  { %741 = vperm.xlu0 %2140, %v2467_v51   ;;  %738 = vperm.xlu1 %2139, %v2440_v44  }
 0x10a   :  { %v2852_v0 = vpop.permute.xlu1 %401 }
 0x10b   :  { %4044 = vst [vmem:[#allocation39_spill] sm:$0xff] %v2852_v0 }
 0x10c   :  { %747 = vperm.xlu0 %2140, %v2489_v57   ;;  %744 = vperm.xlu1 %2139, %v2462_v50  }
 0x10e   :  { %v2856_v29 = vpop.permute.xlu1 %407 }
 0x10f   :  { %4045 = vst [vmem:[#allocation40_spill] sm:$0xff] %v2856_v29  ;;  %v2872_v29 = vpop.permute.xlu0 %422 }
 0x110   :  { %753 = vperm.xlu0 %2140, %v2511_v63   ;;  %750 = vperm.xlu1 %2139, %v4047_v60   ;;  %4055 = vst [vmem:[#allocation9_spill] sm:$0xff] %v2872_v29 }
 0x112   :  { %v2862_v55 = vpop.permute.xlu1 %413 }
 0x113   :  { %4048 = vst [vmem:[#allocation2_spill] sm:$0xff] %v2862_v55  ;;  %v4058_v55 = vld [vmem:[#allocation16_spill] sm:$0xff]  ;;  %v2880_v25 = vpop.permute.xlu0 %428 }
 0x114   :  { %759 = vperm.xlu0 %2140, %v4049_v47   ;;  %756 = vperm.xlu1 %2139, %v4050_v61   ;;  %4060 = vst [vmem:[#allocation8_spill] sm:$0xff] %v2880_v25 }
 0x116   :  { %v2868_v0 = vpop.permute.xlu1 %419 }
 0x117   :  { %4052 = vst [vmem:[#allocation3_spill] sm:$0xff] %v2868_v0  ;;  %v4062_v0 = vld [vmem:[#allocation15_spill] sm:$0xff] }
 0x118   :  { %765 = vperm.xlu0 %2140, %v4053_v1   ;;  %762 = vperm.xlu1 %2139, %v4054_v2  }
 0x11a   :  { %v2876_v31 = vpop.permute.xlu1 %425 }
 0x11b   :  { %4057 = vst [vmem:[#allocation4_spill] sm:$0xff] %v2876_v31 }
 0x11c   :  { %771 = vperm.xlu0 %2140, %v2577_v58   ;;  %768 = vperm.xlu1 %2139, %v4056_v52  }
 0x120   :  { %777 = vperm.xlu0 %2140, %v4058_v55   ;;  %774 = vperm.xlu1 %2139, %v4059_v54  }
 0x122   :  { %v2882_v23 = vpop.permute.xlu1 %464 }
 0x123   :  { %4061 = vst [vmem:[#allocation16_spill] sm:$0xff] %v2882_v23  ;;  %v3018_v23 = vld [vmem:[%s3949_s0 + $0x28] sm:$0xff] }
 0x124   :  { %815 = vperm.xlu0 %2140, %v2660_v3   ;;  %780 = vperm.xlu1 %2139, %v4062_v0  }
 0x126   :  { %v2886_v5 = vpop.permute.xlu1 %474  ;;  %v2888_v29 = vpop.permute.xlu0 %469 }
 0x127   :  { %4063 = vst [vmem:[#allocation12_spill] sm:$0xff] %v2886_v5  ;;  %4064 = vst [vmem:[#allocation15_spill] sm:$0xff] %v2888_v29 }
 0x128   :  { %823 = vperm.xlu0 %2140, %v2664_v62   ;;  %819 = vperm.xlu1 %2139, %v2667_v28  }
 0x12a   :  { %v2892_v31 = vpop.permute.xlu1 %484  ;;  %v2894_v4 = vpop.permute.xlu0 %479 }
 0x12b   :  { %4065 = vst [vmem:[#allocation42_spill] sm:$0xff] %v2892_v31  ;;  %4066 = vst [vmem:[#allocation43_spill] sm:$0xff] %v2894_v4 }
 0x12c   :  { %831 = vperm.xlu0 %2140, %v2675_v41   ;;  %827 = vperm.xlu1 %2139, %v2672_v46  }
 0x12e   :  { %v2898_v25 = vpop.permute.xlu1 %494  ;;  %v2900_v15 = vpop.permute.xlu0 %489 }
 0x12f   :  { %4067 = vst [vmem:[#allocation44_spill] sm:$0xff] %v2898_v25  ;;  %4068 = vst [vmem:[#allocation45_spill] sm:$0xff] %v2900_v15 }
 0x130   :  { %839 = vperm.xlu0 %2140, %v2683_v7   ;;  %835 = vperm.xlu1 %2139, %v2680_v22  }
 0x132   :  { %v2904_v5 = vpop.permute.xlu1 %504  ;;  %v2906_v6 = vpop.permute.xlu0 %499 }
 0x133   :  { %4069 = vst [vmem:[#allocation46_spill] sm:$0xff] %v2904_v5  ;;  %4070 = vst [vmem:[#allocation47_spill] sm:$0xff] %v2906_v6 }
 0x134   :  { %843 = vperm.xlu1 %2139, %v2688_v8   ;;  %847 = vperm.xlu0 %2140, %v2691_v56  }
 0x136   :  { %v2910_v31 = vpop.permute.xlu1 %514  ;;  %v2912_v4 = vpop.permute.xlu0 %509 }
 0x137   :  { %4071 = vst [vmem:[#allocation48_spill] sm:$0xff] %v2910_v31  ;;  %4072 = vst [vmem:[#allocation49_spill] sm:$0xff] %v2912_v4 }
 0x138   :  { %851 = vperm.xlu1 %2139, %v2696_v10   ;;  %855 = vperm.xlu0 %2140, %v2699_v35  }
 0x13a   :  { %v2916_v25 = vpop.permute.xlu1 %524  ;;  %v2918_v15 = vpop.permute.xlu0 %519 }
 0x13b   :  { %4073 = vst [vmem:[#allocation50_spill] sm:$0xff] %v2916_v25  ;;  %4074 = vst [vmem:[#allocation51_spill] sm:$0xff] %v2918_v15 }
 0x13c   :  { %859 = vperm.xlu1 %2139, %v2704_v18   ;;  %863 = vperm.xlu0 %2140, %v2707_v9  }
 0x13e   :  { %v2922_v5 = vpop.permute.xlu1 %534  ;;  %v2924_v6 = vpop.permute.xlu0 %529 }
 0x13f   :  { %4075 = vst [vmem:[#allocation52_spill] sm:$0xff] %v2922_v5  ;;  %4076 = vst [vmem:[#allocation53_spill] sm:$0xff] %v2924_v6 }
 0x140   :  { %867 = vperm.xlu1 %2139, %v2712_v24   ;;  %871 = vperm.xlu0 %2140, %v2715_v11  }
 0x142   :  { %v2928_v31 = vpop.permute.xlu1 %544  ;;  %v2930_v4 = vpop.permute.xlu0 %539 }
 0x143   :  { %4077 = vst [vmem:[#allocation54_spill] sm:$0xff] %v2928_v31  ;;  %4078 = vst [vmem:[#allocation55_spill] sm:$0xff] %v2930_v4 }
 0x144   :  { %875 = vperm.xlu1 %2139, %v2720_v30   ;;  %879 = vperm.xlu0 %2140, %v2723_v34  }
 0x146   :  { %v2934_v25 = vpop.permute.xlu1 %554  ;;  %v2936_v15 = vpop.permute.xlu0 %549 }
 0x147   :  { %4079 = vst [vmem:[#allocation56_spill] sm:$0xff] %v2934_v25  ;;  %4080 = vst [vmem:[#allocation57_spill] sm:$0xff] %v2936_v15  ;;  %v4085_v25 = vld [vmem:[#allocation7_spill] sm:$0xff] }
 0x148   :  { %883 = vperm.xlu1 %2139, %v2728_v36   ;;  %887 = vperm.xlu0 %2140, %v2731_v13  }
 0x14a   :  { %v2940_v5 = vpop.permute.xlu1 %564  ;;  %v2942_v6 = vpop.permute.xlu0 %559 }
 0x14b   :  { %4081 = vst [vmem:[#allocation58_spill] sm:$0xff] %v2940_v5  ;;  %4082 = vst [vmem:[#allocation59_spill] sm:$0xff] %v2942_v6 }
 0x14c   :  { %891 = vperm.xlu1 %2139, %v2736_v42   ;;  %895 = vperm.xlu0 %2140, %v2739_v19  }
 0x14e   :  { %v2946_v4 = vpop.permute.xlu1 %574  ;;  %v2948_v31 = vpop.permute.xlu0 %569 }
 0x14f   :  { %4083 = vst [vmem:[#allocation60_spill] sm:$0xff] %v2946_v4  ;;  %4084 = vst [vmem:[#allocation61_spill] sm:$0xff] %v2948_v31 }
 0x150   :  { %899 = vperm.xlu1 %2139, %v2744_v48   ;;  %903 = vperm.xlu0 %2140, %v4085_v25  }
 0x152   :  { %v2952_v15 = vpop.permute.xlu1 %584  ;;  %v2954_v29 = vpop.permute.xlu0 %579 }
 0x153   :  { %4086 = vst [vmem:[#allocation7_spill] sm:$0xff] %v2952_v15  ;;  %4087 = vst [vmem:[#allocation62_spill] sm:$0xff] %v2954_v29 }
 0x154   :  { %907 = vperm.xlu1 %2139, %v2752_v49   ;;  %911 = vperm.xlu0 %2140, %v2755_v53  }
 0x156   :  { %v2958_v5 = vpop.permute.xlu1 %594  ;;  %v2960_v6 = vpop.permute.xlu0 %589 }
 0x157   :  { %4088 = vst [vmem:[#allocation63_spill] sm:$0xff] %v2958_v5  ;;  %4089 = vst [vmem:[#allocation64_spill] sm:$0xff] %v2960_v6 }
 0x158   :  { %915 = vperm.xlu1 %2139, %v2762_v16   ;;  %919 = vperm.xlu0 %2140, %v2765_v37   ;;  %v3039_v16 = vld [vmem:[%s3949_s0 + $0x30] sm:$0xff] }
 0x159   :  { %4104 = vst [vmem:[#allocation79_spill] sm:$0xff] %v3039_v16 }
 0x15a   :  { %v2964_v4 = vpop.permute.xlu1 %604  ;;  %v2966_v31 = vpop.permute.xlu0 %599 }
 0x15b   :  { %4090 = vst [vmem:[#allocation65_spill] sm:$0xff] %v2964_v4  ;;  %4091 = vst [vmem:[#allocation66_spill] sm:$0xff] %v2966_v31  ;;  %v3985_v4 = vmov 2   ;;  %v2985_v31 = vld [vmem:[%s3949_s0] sm:$0xff] }
 0x15c   :  { %923 = vperm.xlu1 %2139, %v2772_v12   ;;  %927 = vperm.xlu0 %2140, %v2777_v40  }
 0x15e   :  { %v2970_v15 = vpop.permute.xlu1 %614  ;;  %v2972_v29 = vpop.permute.xlu0 %609 }
 0x15f   :  { %4092 = vst [vmem:[#allocation67_spill] sm:$0xff] %v2970_v15  ;;  %4093 = vst [vmem:[#allocation68_spill] sm:$0xff] %v2972_v29 }
 0x160   :  { %931 = vperm.xlu1 %2139, %v2784_v43   ;;  %935 = vperm.xlu0 %2140, %v2787_v17  }
 0x162   :  { %v2976_v5 = vpop.permute.xlu0 %619 }
 0x163   :  { %4094 = vst [vmem:[#allocation69_spill] sm:$0xff] %v2976_v5  ;;  %v2978_v6 = vpop.permute.xlu1 %687  ;;  %v2996_v5 = vld [vmem:[%s3949_s0 + $0x8] sm:$0xff] }
 0x164   :  { %4095 = vst [vmem:[#allocation70_spill] sm:$0xff] %v2978_v6  ;;  %939 = vperm.xlu1 %2139, %v2796_v59   ;;  %2141 = vset.pattern.permute.xlu0 %v3985_v4  ;;  %v3002_v59 = vld [vmem:[%s3949_s0 + $0x18] sm:$0xff] }
 0x165   :  { %1007 = vperm.xlu0 %2141, %v2985_v31  }
 0x167   :  { %v2988_v15 = vpop.permute.xlu1 %693  ;;  %v2990_v29 = vpop.permute.xlu0 %690 }
 0x168   :  { %4096 = vst [vmem:[#allocation71_spill] sm:$0xff] %v2988_v15  ;;  %4097 = vst [vmem:[#allocation72_spill] sm:$0xff] %v2990_v29  ;;  %2142 = vset.pattern.permute.xlu1 %v3985_v4  ;;  %v3012_v4 = vld [vmem:[%s3949_s0 + $0x10] sm:$0xff] }
 0x169   :  { %1010 = vperm.xlu1 %2142, %v2996_v5   ;;  %1016 = vperm.xlu0 %2141, %v3002_v59  }
 0x16b   :  { %v3005_v43 = vpop.permute.xlu1 %696  ;;  %v3007_v15 = vpop.permute.xlu0 %699 }
 0x16c   :  { %4098 = vst [vmem:[#allocation73_spill] sm:$0xff] %v3005_v43  ;;  %4099 = vst [vmem:[#allocation74_spill] sm:$0xff] %v3007_v15  ;;  %v3028_v15 = vld [vmem:[%s3949_s0 + $0x20] sm:$0xff] }
 0x16d   :  { %1013 = vperm.xlu1 %2142, %v3012_v4   ;;  %1022 = vperm.xlu0 %2141, %v3018_v23  }
 0x16f   :  { %v3021_v6 = vpop.permute.xlu1 %702  ;;  %v3023_v29 = vpop.permute.xlu0 %705 }
 0x170   :  { %4100 = vst [vmem:[#allocation75_spill] sm:$0xff] %v3021_v6  ;;  %4101 = vst [vmem:[#allocation76_spill] sm:$0xff] %v3023_v29 }
 0x171   :  { %1019 = vperm.xlu1 %2142, %v3028_v15   ;;  %1028 = vperm.xlu0 %2141, %v2330_v14  }
 0x173   :  { %v3032_v43 = vpop.permute.xlu1 %708  ;;  %v3034_v12 = vpop.permute.xlu0 %711 }
 0x174   :  { %4102 = vst [vmem:[#allocation77_spill] sm:$0xff] %v3032_v43  ;;  %4103 = vst [vmem:[#allocation78_spill] sm:$0xff] %v3034_v12 }
 0x175   :  { %1025 = vperm.xlu1 %2142, %v3039_v16   ;;  %1034 = vperm.xlu0 %2141, %v2352_v20  }
 0x177   :  { %v3043_v29 = vpop.permute.xlu1 %714  ;;  %v3045_v6 = vpop.permute.xlu0 %717 }
 0x178   :  { %4105 = vst [vmem:[#allocation80_spill] sm:$0xff] %v3043_v29  ;;  %4106 = vst [vmem:[#allocation81_spill] sm:$0xff] %v3045_v6  ;;  %v3992_v29 = vmov 3  }
 0x179   :  { %1031 = vperm.xlu1 %2142, %v2357_v21   ;;  %1040 = vperm.xlu0 %2141, %v2374_v26  }
 0x17b   :  { %v3049_v14 = vpop.permute.xlu1 %720  ;;  %v3051_v12 = vpop.permute.xlu0 %723 }
 0x17c   :  { %4107 = vst [vmem:[#allocation82_spill] sm:$0xff] %v3049_v14  ;;  %4108 = vst [vmem:[#allocation83_spill] sm:$0xff] %v3051_v12 }
 0x17d   :  { %1037 = vperm.xlu1 %2142, %v2379_v27   ;;  %1046 = vperm.xlu0 %2141, %v2396_v32  }
 0x17f   :  { %v3055_v43 = vpop.permute.xlu1 %726  ;;  %v3057_v16 = vpop.permute.xlu0 %729 }
 0x180   :  { %4109 = vst [vmem:[#allocation84_spill] sm:$0xff] %v3055_v43  ;;  %4110 = vst [vmem:[#allocation85_spill] sm:$0xff] %v3057_v16 }
 0x181   :  { %1043 = vperm.xlu1 %2142, %v2401_v33   ;;  %1052 = vperm.xlu0 %2141, %v2418_v38  }
 0x183   :  { %v3061_v20 = vpop.permute.xlu1 %732  ;;  %v3063_v21 = vpop.permute.xlu0 %735 }
 0x184   :  { %4111 = vst [vmem:[#allocation86_spill] sm:$0xff] %v3061_v20 }
 0x185   :  { %1049 = vperm.xlu1 %2142, %v2423_v39   ;;  %1058 = vperm.xlu0 %2141, %v2440_v44  }
 0x187   :  { %v3067_v26 = vpop.permute.xlu1 %738  ;;  %v3069_v27 = vpop.permute.xlu0 %741 }
 0x189   :  { %1055 = vperm.xlu1 %2142, %v2445_v45   ;;  %1064 = vperm.xlu0 %2141, %v2462_v50  }
 0x18b   :  { %v3073_v32 = vpop.permute.xlu1 %744  ;;  %v3075_v33 = vpop.permute.xlu0 %747 }
 0x18d   :  { %1061 = vperm.xlu1 %2142, %v2467_v51   ;;  %1070 = vperm.xlu0 %2141, %v4047_v60  }
 0x18f   :  { %v3079_v38 = vpop.permute.xlu1 %750  ;;  %v3081_v39 = vpop.permute.xlu0 %753 }
 0x190   :  { %4112 = vst [vmem:[#allocation87_spill] sm:$0xff] %v3081_v39 }
 0x191   :  { %1067 = vperm.xlu1 %2142, %v2489_v57   ;;  %1076 = vperm.xlu0 %2141, %v4050_v61  }
 0x193   :  { %v3085_v44 = vpop.permute.xlu1 %756  ;;  %v3087_v45 = vpop.permute.xlu0 %759 }
 0x194   :  { %4113 = vst [vmem:[#allocation88_spill] sm:$0xff] %v3085_v44  ;;  %4114 = vst [vmem:[#allocation89_spill] sm:$0xff] %v3087_v45 }
 0x195   :  { %1073 = vperm.xlu1 %2142, %v2511_v63   ;;  %1082 = vperm.xlu0 %2141, %v4054_v2  }
 0x197   :  { %v3091_v50 = vpop.permute.xlu1 %762  ;;  %v3093_v51 = vpop.permute.xlu0 %765 }
 0x198   :  { %4115 = vst [vmem:[#allocation90_spill] sm:$0xff] %v3091_v50  ;;  %4116 = vst [vmem:[#allocation91_spill] sm:$0xff] %v3093_v51  ;;  %v1650_v50 = vld [vmem:[%s3950_s1 + $0x20] sm:$0xff] }
 0x199   :  { %1079 = vperm.xlu1 %2142, %v4049_v47   ;;  %1088 = vperm.xlu0 %2141, %v4056_v52  }
 0x19b   :  { %v3097_v60 = vpop.permute.xlu1 %768  ;;  %v3099_v57 = vpop.permute.xlu0 %771 }
 0x19c   :  { %4117 = vst [vmem:[#allocation92_spill] sm:$0xff] %v3097_v60  ;;  %4118 = vst [vmem:[#allocation93_spill] sm:$0xff] %v3099_v57 }
 0x19d   :  { %1085 = vperm.xlu1 %2142, %v4053_v1   ;;  %1094 = vperm.xlu0 %2141, %v4059_v54  }
 0x19f   :  { %v3103_v61 = vpop.permute.xlu1 %774  ;;  %v3105_v63 = vpop.permute.xlu0 %777 }
 0x1a0   :  { %4119 = vst [vmem:[#allocation94_spill] sm:$0xff] %v3103_v61  ;;  %4120 = vst [vmem:[#allocation95_spill] sm:$0xff] %v3105_v63 }
 0x1a1   :  { %1091 = vperm.xlu1 %2142, %v2577_v58   ;;  %1100 = vperm.xlu0 %2141, %v4062_v0  }
 0x1a3   :  { %v3109_v2 = vpop.permute.xlu1 %780  ;;  %v3111_v47 = vpop.permute.xlu0 %815 }
 0x1a4   :  { %4121 = vst [vmem:[#allocation96_spill] sm:$0xff] %v3109_v2 }
 0x1a5   :  { %1097 = vperm.xlu1 %2142, %v4058_v55   ;;  %1139 = vperm.xlu0 %2141, %v2667_v28  }
 0x1a7   :  { %v3115_v52 = vpop.permute.xlu1 %819  ;;  %v3117_v1 = vpop.permute.xlu0 %823 }
 0x1a9   :  { %1135 = vperm.xlu1 %2142, %v2660_v3   ;;  %1147 = vperm.xlu0 %2141, %v2672_v46  }
 0x1ab   :  { %v3121_v54 = vpop.permute.xlu1 %827  ;;  %v3123_v58 = vpop.permute.xlu0 %831 }
 0x1ad   :  { %1143 = vperm.xlu1 %2142, %v2664_v62   ;;  %1155 = vperm.xlu0 %2141, %v2680_v22  }
 0x1af   :  { %v3127_v0 = vpop.permute.xlu1 %835  ;;  %v3129_v55 = vpop.permute.xlu0 %839 }
 0x1b1   :  { %1151 = vperm.xlu1 %2142, %v2675_v41   ;;  %1163 = vperm.xlu0 %2141, %v2688_v8  }
 0x1b3   :  { %v3133_v2 = vpop.permute.xlu1 %843  ;;  %v3135_v63 = vpop.permute.xlu0 %847 }
 0x1b4   :  { %4122 = vst [vmem:[#allocation97_spill] sm:$0xff] %v3135_v63 }
 0x1b5   :  { %1159 = vperm.xlu1 %2142, %v2683_v7   ;;  %1171 = vperm.xlu0 %2141, %v2696_v10  }
 0x1b7   :  { %v3139_v20 = vpop.permute.xlu1 %851  ;;  %v3141_v16 = vpop.permute.xlu0 %855 }
 0x1b8   :  { %4123 = vst [vmem:[#allocation98_spill] sm:$0xff] %v3139_v20  ;;  %4124 = vst [vmem:[#allocation99_spill] sm:$0xff] %v3141_v16  ;;  %v1649_v16 = vld [vmem:[%s3950_s1 + $0x18] sm:$0xff]  ;;  %v1652_v20 = vld [vmem:[%s3950_s1 + $0x30] sm:$0xff] }
 0x1b9   :  { %1167 = vperm.xlu1 %2142, %v2691_v56   ;;  %1179 = vperm.xlu0 %2141, %v2704_v18  }
 0x1bb   :  { %v3145_v61 = vpop.permute.xlu1 %859  ;;  %v3147_v57 = vpop.permute.xlu0 %863 }
 0x1bc   :  { %4125 = vst [vmem:[#allocation100_spill] sm:$0xff] %v3145_v61  ;;  %4126 = vst [vmem:[#allocation101_spill] sm:$0xff] %v3147_v57  ;;  %v1646_v57 = vld [vmem:[%s3950_s1] sm:$0xff]  ;;  %v1647_v61 = vld [vmem:[%s3950_s1 + $0x8] sm:$0xff] }
 0x1bd   :  { %1175 = vperm.xlu1 %2142, %v2699_v35   ;;  %1187 = vperm.xlu0 %2141, %v2712_v24  }
 0x1bf   :  { %v3151_v43 = vpop.permute.xlu1 %867  ;;  %v3153_v12 = vpop.permute.xlu0 %871 }
 0x1c0   :  { %4127 = vst [vmem:[#allocation102_spill] sm:$0xff] %v3151_v43  ;;  %4128 = vst [vmem:[#allocation103_spill] sm:$0xff] %v3153_v12  ;;  %v2084_v12 = vpack.c.bf16 %v1647_v61, %v1646_v57 }
 0x1c1   :  { %1183 = vperm.xlu1 %2142, %v2707_v9   ;;  %1195 = vperm.xlu0 %2141, %v2720_v30  }
 0x1c2   :  { %2085 = vmatprep.subr.bf16.mxu0 %v2084_v12  ;;  %2116 = vmatprep.subr.bf16.mxu1 %v2084_v12 }
 0x1c3   :  { %v3157_v60 = vpop.permute.xlu1 %875  ;;  %v3159_v51 = vpop.permute.xlu0 %879  ;;  %2087 = vmatpush3.bf16.msra.mxu0 %v2084_v12  ;;  %2124 = vmatpush3.bf16.msra.mxu1 %v2084_v12  ;;  %v1651_v12 = vld [vmem:[%s3950_s1 + $0x28] sm:$0xff] }
 0x1c4   :  { %4129 = vst [vmem:[#allocation104_spill] sm:$0xff] %v3157_v60  ;;  %v1648_v60 = vld [vmem:[%s3950_s1 + $0x10] sm:$0xff] }
 0x1c5   :  { %1191 = vperm.xlu1 %2142, %v2715_v11   ;;  %1203 = vperm.xlu0 %2141, %v2728_v36   ;;  %v2088_v57 = vpack.c.bf16 %v1649_v16, %v1648_v60  ;;  %v2092_v16 = vpack.c.bf16 %v1651_v12, %v1650_v50  ;;  %v2230_v12 = vld [vmem:[%s3949_s0 + $0x80] sm:$0xff] }
 0x1c7   :  { %v3169_v43 = vpop.permute.xlu1 %883  ;;  %v3171_v14 = vpop.permute.xlu0 %887  ;;  %2089 = vmatprep.subr.bf16.mxu0 %v2088_v57  ;;  %2117 = vmatprep.subr.bf16.mxu1 %v2088_v57 }
 0x1c8   :  { %2091 = vmatpush3.bf16.msra.mxu0 %v2088_v57  ;;  %2125 = vmatpush3.bf16.msra.mxu1 %v2088_v57  ;;  %v1653_v57 = vld [vmem:[%s3950_s1 + $0x38] sm:$0xff] }
 0x1c9   :  { %1199 = vperm.xlu1 %2142, %v2723_v34   ;;  %1215 = vperm.xlu0 %2141, %v2739_v19   ;;  %v2096_v50 = vpack.c.bf16 %v1653_v57, %v1652_v20  ;;  %v1655_v20 = vld [vmem:[%s3950_s1 + $0x48] sm:$0xff] }
 0x1ca   :  { %2093 = vmatprep.subr.bf16.mxu0 %v2092_v16  ;;  %2118 = vmatprep.subr.bf16.mxu1 %v2092_v16 }
 0x1cb   :  { %v3181_v61 = vpop.permute.xlu1 %891  ;;  %v3183_v6 = vpop.permute.xlu0 %895 }
 0x1cc   :  { %2095 = vmatpush3.bf16.msra.mxu0 %v2092_v16  ;;  %2126 = vmatpush3.bf16.msra.mxu1 %v2092_v16  ;;  %v1654_v16 = vld [vmem:[%s3950_s1 + $0x40] sm:$0xff] }
 0x1cd   :  { %1207 = vperm.xlu1 %2142, %v2731_v13   ;;  %1223 = vperm.xlu0 %2141, %v4085_v25   ;;  %v2100_v57 = vpack.c.bf16 %v1655_v20, %v1654_v16 }
 0x1ce   :  { %2097 = vmatprep.subr.bf16.mxu0 %v2096_v50  ;;  %2119 = vmatprep.subr.bf16.mxu1 %v2096_v50 }
 0x1cf   :  { %v3193_v60 = vpop.permute.xlu1 %899  ;;  %v3195_v45 = vpop.permute.xlu0 %903 }
 0x1d0   :  { %4130 = vst [vmem:[#allocation105_spill] sm:$0xff] %v3195_v45  ;;  %2099 = vmatpush3.bf16.msra.mxu0 %v2096_v50  ;;  %2127 = vmatpush3.bf16.msra.mxu1 %v2096_v50  ;;  %v1657_v50 = vld [vmem:[%s3950_s1 + $0x58] sm:$0xff]  ;;  %v4178_v45 = vld [vmem:[#allocation70_spill] sm:$0xff] }
 0x1d1   :  { %2143 = vset.pattern.permute.xlu1 %v3992_v29  ;;  %1231 = vperm.xlu0 %2141, %v2755_v53  }
 0x1d2   :  { %1375 = vperm.xlu1 %2143, %v2230_v12   ;;  %2101 = vmatprep.subr.bf16.mxu0 %v2100_v57 }
 0x1d3   :  { %v3208_v63 = vpop.permute.xlu1 %907  ;;  %v3210_v44 = vpop.permute.xlu0 %911  ;;  %2120 = vmatprep.subr.bf16.mxu1 %v2100_v57 }
 0x1d4   :  { %4131 = vst [vmem:[#allocation106_spill] sm:$0xff] %v3208_v63  ;;  %4132 = vst [vmem:[#allocation107_spill] sm:$0xff] %v3210_v44  ;;  %2103 = vmatpush3.bf16.msra.mxu0 %v2100_v57  ;;  %v1656_v44 = vld [vmem:[%s3950_s1 + $0x50] sm:$0xff]  ;;  %2128 = vmatpush3.bf16.msra.mxu1 %v2100_v57  ;;  %v1659_v57 = vld [vmem:[%s3950_s1 + $0x68] sm:$0xff] }
 0x1d5   :  { %1239 = vperm.xlu0 %2141, %v2765_v37   ;;  %v2104_v16 = vpack.c.bf16 %v1657_v50, %v1656_v44 }
 0x1d6   :  { %1330 = vperm.xlu1 %2143, %v2996_v5  }
 0x1d7   :  { %v3220_v12 = vpop.permute.xlu1 %915  ;;  %v3222_v29 = vpop.permute.xlu0 %919  ;;  %2105 = vmatprep.subr.bf16.mxu0 %v2104_v16  ;;  %2121 = vmatprep.subr.bf16.mxu1 %v2104_v16 }
 0x1d8   :  { %4133 = vst [vmem:[#allocation108_spill] sm:$0xff] %v3220_v12  ;;  %4134 = vst [vmem:[#allocation109_spill] sm:$0xff] %v3222_v29  ;;  %2107 = vmatpush3.bf16.msra.mxu0 %v2104_v16  ;;  %v1658_v29 = vld [vmem:[%s3950_s1 + $0x60] sm:$0xff]  ;;  %2129 = vmatpush3.bf16.msra.mxu1 %v2104_v16  ;;  %v1661_v16 = vld [vmem:[%s3950_s1 + $0x78] sm:$0xff] }
 0x1d9   :  { %1247 = vperm.xlu0 %2141, %v2777_v40   ;;  %v2108_v44 = vpack.c.bf16 %v1659_v57, %v1658_v29 }
 0x1da   :  { %1455 = vperm.xlu1 %2143, %v2660_v3  }
 0x1db   :  { %v3232_v5 = vpop.permute.xlu1 %923  ;;  %v3234_v20 = vpop.permute.xlu0 %927  ;;  %2109 = vmatprep.subr.bf16.mxu0 %v2108_v44  ;;  %2122 = vmatprep.subr.bf16.mxu1 %v2108_v44 }
 0x1dc   :  { %4135 = vst [vmem:[#allocation110_spill] sm:$0xff] %v3232_v5  ;;  %4136 = vst [vmem:[#allocation111_spill] sm:$0xff] %v3234_v20  ;;  %2111 = vmatpush3.bf16.msra.mxu0 %v2108_v44  ;;  %v1660_v20 = vld [vmem:[%s3950_s1 + $0x70] sm:$0xff]  ;;  %2130 = vmatpush3.bf16.msra.mxu1 %v2108_v44  ;;  %v4139_v5 = vmov 3   ;;  %v2231_v44 = vld [vmem:[%s3949_s0 + $0x88] sm:$0xff] }
 0x1dd   :  { %1255 = vperm.xlu0 %2141, %v2787_v17   ;;  %v2112_v29 = vpack.c.bf16 %v1661_v16, %v1660_v20 }
 0x1de   :  { %1459 = vperm.xlu1 %2143, %v2667_v28   ;;  %v4140_v28 = vmov 2  }
 0x1df   :  { %v3244_v3 = vpop.permute.xlu1 %931  ;;  %v3246_v50 = vpop.permute.xlu0 %935  ;;  %2113 = vmatprep.subr.bf16.mxu0 %v2112_v29  ;;  %2123 = vmatprep.subr.bf16.mxu1 %v2112_v29 }
 0x1e0   :  { %4137 = vst [vmem:[#allocation112_spill] sm:$0xff] %v3244_v3  ;;  %4138 = vst [vmem:[#allocation113_spill] sm:$0xff] %v3246_v50  ;;  %2115 = vmatpush3.bf16.msra.mxu0 %v2112_v29  ;;  %2131 = vmatpush3.bf16.msra.mxu1 %v2112_v29  ;;  %v2233_v29 = vld [vmem:[%s3949_s0 + $0x98] sm:$0xff] }
 0x1e1   :  { %2156 = vset.pattern.permute.xlu0 %v4139_v5 }
 0x1e2   :  { %2144 = vset.pattern.permute.xlu1 %v4140_v28  ;;  %1327 = vperm.xlu0 %2156, %v2985_v31   ;;  %v2232_v31 = vld [vmem:[%s3949_s0 + $0x90] sm:$0xff] }
 0x1e3   :  { %1211 = vperm.xlu1 %2144, %v2736_v42   ;;  %v3258_v57 = vpop.permute.xlu1 %939 }
 0x1e4   :  { %4141 = vst [vmem:[#allocation114_spill] sm:$0xff] %v3258_v57  ;;  %v3260_v50 = vpop.permute.xlu0 %1007 }
 0x1e6   :  { %1378 = vperm.xlu0 %2156, %v2231_v44  }
 0x1e7   :  { %2145 = vset.pattern.permute.xlu1 %v4139_v5 }
 0x1e8   :  { %1381 = vperm.xlu1 %2145, %v2232_v31   ;;  %v3269_v20 = vpop.permute.xlu1 %1010  ;;  %v3271_v16 = vpop.permute.xlu0 %1016 }
 0x1ea   :  { %1519 = vperm.xlu0 %2156, %v2723_v34  }
 0x1ec   :  { %1384 = vperm.xlu1 %2145, %v2233_v29   ;;  %v3277_v57 = vpop.permute.xlu1 %1013  ;;  %v3279_v44 = vpop.permute.xlu0 %1022 }
 0x1ee   :  { %1523 = vperm.xlu0 %2156, %v2728_v36  }
 0x1f0   :  { %1527 = vperm.xlu1 %2145, %v2731_v13   ;;  %v3283_v31 = vpop.permute.xlu1 %1019  ;;  %v3285_v3 = vpop.permute.xlu0 %1028 }
 0x1f2   :  { %1333 = vperm.xlu0 %2156, %v3012_v4  }
 0x1f4   :  { %1531 = vperm.xlu1 %2145, %v2736_v42   ;;  %v3289_v34 = vpop.permute.xlu1 %1025  ;;  %v3291_v12 = vpop.permute.xlu0 %1034 }
 0x1f5   :  { %4142 = vst [vmem:[#allocation115_spill] sm:$0xff] %v3291_v12 }
 0x1f6   :  { %1336 = vperm.xlu0 %2156, %v3002_v59  }
 0x1f8   :  { %2146 = vset.pattern.permute.xlu1 %v4140_v28  ;;  %v3295_v29 = vpop.permute.xlu1 %1031  ;;  %v3297_v36 = vpop.permute.xlu0 %1040 }
 0x1f9   :  { %4143 = vst [vmem:[#allocation116_spill] sm:$0xff] %v3295_v29  ;;  %4144 = vst [vmem:[#allocation117_spill] sm:$0xff] %v3297_v36  ;;  %1219 = vperm.xlu1 %2146, %v2744_v48  }
 0x1fa   :  { %1463 = vperm.xlu0 %2156, %v2664_v62   ;;  %v2234_v62 = vld [vmem:[%s3949_s0 + $0xa0] sm:$0xff] }
 0x1fc   :  { %v3301_v13 = vpop.permute.xlu1 %1037  ;;  %v3303_v4 = vpop.permute.xlu0 %1046 }
 0x1fd   :  { %4145 = vst [vmem:[#allocation118_spill] sm:$0xff] %v3301_v13  ;;  %4146 = vst [vmem:[#allocation119_spill] sm:$0xff] %v3303_v4  ;;  %2147 = vset.pattern.permute.xlu1 %v4139_v5  ;;  %v2238_v13 = vld [vmem:[%s3949_s0 + $0x38] sm:$0xff] }
 0x1fe   :  { %1339 = vperm.xlu1 %2147, %v3028_v15   ;;  %1467 = vperm.xlu0 %2156, %v2672_v46   ;;  %v2235_v15 = vld [vmem:[%s3949_s0 + $0xa8] sm:$0xff] }
 0x200   :  { %v3308_v42 = vpop.permute.xlu1 %1043  ;;  %v3310_v59 = vpop.permute.xlu0 %1052 }
 0x201   :  { %4147 = vst [vmem:[#allocation120_spill] sm:$0xff] %v3308_v42  ;;  %4148 = vst [vmem:[#allocation121_spill] sm:$0xff] %v3310_v59 }
 0x202   :  { %1342 = vperm.xlu1 %2147, %v3018_v23   ;;  %1387 = vperm.xlu0 %2156, %v2234_v62  }
 0x204   :  { %v3316_v36 = vpop.permute.xlu1 %1049  ;;  %v3318_v4 = vpop.permute.xlu0 %1058 }
 0x205   :  { %4149 = vst [vmem:[#allocation122_spill] sm:$0xff] %v3316_v36 }
 0x206   :  { %1390 = vperm.xlu1 %2147, %v2235_v15   ;;  %1471 = vperm.xlu0 %2156, %v2675_v41   ;;  %v2236_v15 = vld [vmem:[%s3949_s0 + $0xb0] sm:$0xff] }
 0x208   :  { %v3324_v46 = vpop.permute.xlu1 %1055  ;;  %v3326_v59 = vpop.permute.xlu0 %1064 }
 0x20a   :  { %1535 = vperm.xlu1 %2147, %v2739_v19   ;;  %1475 = vperm.xlu0 %2156, %v2680_v22  }
 0x20c   :  { %v3330_v23 = vpop.permute.xlu1 %1061  ;;  %v3332_v62 = vpop.permute.xlu0 %1070 }
 0x20e   :  { %1539 = vperm.xlu1 %2147, %v2744_v48   ;;  %1393 = vperm.xlu0 %2156, %v2236_v15   ;;  %v4153_v48 = vld [vmem:[#allocation79_spill] sm:$0xff] }
 0x210   :  { %v3338_v41 = vpop.permute.xlu1 %1067  ;;  %v3340_v36 = vpop.permute.xlu0 %1076 }
 0x211   :  { %4150 = vst [vmem:[#allocation123_spill] sm:$0xff] %v3340_v36 }
 0x212   :  { %2148 = vset.pattern.permute.xlu1 %v4140_v28  ;;  %1479 = vperm.xlu0 %2156, %v2683_v7   ;;  %v2237_v7 = vld [vmem:[%s3949_s0 + $0xc0] sm:$0xff] }
 0x213   :  { %1227 = vperm.xlu1 %2148, %v2752_v49  }
 0x214   :  { %v3345_v22 = vpop.permute.xlu1 %1073  ;;  %v3347_v19 = vpop.permute.xlu0 %1082 }
 0x215   :  { %4151 = vst [vmem:[#allocation124_spill] sm:$0xff] %v3345_v22  ;;  %4152 = vst [vmem:[#allocation125_spill] sm:$0xff] %v3347_v19  ;;  %v4176_v22 = vld [vmem:[#allocation72_spill] sm:$0xff] }
 0x216   :  { %1483 = vperm.xlu0 %2156, %v2688_v8  }
 0x217   :  { %2149 = vset.pattern.permute.xlu1 %v4139_v5 }
 0x218   :  { %1345 = vperm.xlu1 %2149, %v4153_v48   ;;  %v3352_v15 = vpop.permute.xlu1 %1079  ;;  %v3354_v42 = vpop.permute.xlu0 %1088  ;;  %v2239_v48 = vld [vmem:[%s3949_s0 + $0xb8] sm:$0xff] }
 0x219   :  { %4154 = vst [vmem:[#allocation79_spill] sm:$0xff] %v3352_v15  ;;  %4155 = vst [vmem:[#allocation126_spill] sm:$0xff] %v3354_v42 }
 0x21a   :  { %1399 = vperm.xlu0 %2156, %v2237_v7  }
 0x21c   :  { %1348 = vperm.xlu1 %2149, %v2238_v13   ;;  %v3362_v19 = vpop.permute.xlu1 %1085  ;;  %v3364_v8 = vpop.permute.xlu0 %1094 }
 0x21d   :  { %4156 = vst [vmem:[#allocation127_spill] sm:$0xff] %v3362_v19  ;;  %4157 = vst [vmem:[#allocation128_spill] sm:$0xff] %v3364_v8 }
 0x21e   :  { %1487 = vperm.xlu0 %2156, %v2691_v56   ;;  %v2240_v56 = vld [vmem:[%s3949_s0 + $0xd0] sm:$0xff] }
 0x220   :  { %1396 = vperm.xlu1 %2149, %v2239_v48   ;;  %v3370_v42 = vpop.permute.xlu1 %1091  ;;  %v3372_v15 = vpop.permute.xlu0 %1100 }
 0x221   :  { %4158 = vst [vmem:[#allocation129_spill] sm:$0xff] %v3370_v42  ;;  %4159 = vst [vmem:[#allocation130_spill] sm:$0xff] %v3372_v15  ;;  %v4161_v15 = vld [vmem:[#allocation11_spill] sm:$0xff] }
 0x222   :  { %1491 = vperm.xlu0 %2156, %v2696_v10  }
 0x224   :  { %1543 = vperm.xlu1 %2149, %v4085_v25   ;;  %v3376_v13 = vpop.permute.xlu1 %1097  ;;  %v3378_v7 = vpop.permute.xlu0 %1139 }
 0x225   :  { %4160 = vst [vmem:[#allocation131_spill] sm:$0xff] %v3376_v13 }
 0x226   :  { %1405 = vperm.xlu0 %2156, %v2240_v56  }
 0x228   :  { %1547 = vperm.xlu1 %2149, %v2752_v49   ;;  %v3384_v48 = vpop.permute.xlu1 %1135  ;;  %v3386_v8 = vpop.permute.xlu0 %1147  ;;  %v2242_v49 = vld [vmem:[%s3949_s0 + $0xe0] sm:$0xff] }
 0x22a   :  { %1495 = vperm.xlu0 %2156, %v2699_v35   ;;  %v2241_v35 = vld [vmem:[%s3949_s0 + $0x40] sm:$0xff] }
 0x22c   :  { %2150 = vset.pattern.permute.xlu1 %v4140_v28  ;;  %v3390_v10 = vpop.permute.xlu1 %1143  ;;  %v3392_v25 = vpop.permute.xlu0 %1155 }
 0x22d   :  { %1235 = vperm.xlu1 %2150, %v4161_v15  }
 0x22e   :  { %1499 = vperm.xlu0 %2156, %v2704_v18   ;;  %v2243_v18 = vld [vmem:[%s3949_s0 + $0x48] sm:$0xff] }
 0x230   :  { %v3396_v13 = vpop.permute.xlu1 %1151  ;;  %v3398_v56 = vpop.permute.xlu0 %1163 }
 0x231   :  { %4162 = vst [vmem:[#allocation11_spill] sm:$0xff] %v3398_v56  ;;  %2151 = vset.pattern.permute.xlu1 %v4139_v5 }
 0x232   :  { %1351 = vperm.xlu1 %2151, %v2241_v35   ;;  %1411 = vperm.xlu0 %2156, %v2242_v49   ;;  %v2244_v35 = vld [vmem:[%s3949_s0 + $0xc8] sm:$0xff] }
 0x234   :  { %v3407_v42 = vpop.permute.xlu1 %1159  ;;  %v3409_v19 = vpop.permute.xlu0 %1171 }
 0x235   :  { %4163 = vst [vmem:[#allocation132_spill] sm:$0xff] %v3409_v19 }
 0x236   :  { %1354 = vperm.xlu1 %2151, %v2243_v18   ;;  %1503 = vperm.xlu0 %2156, %v2707_v9   ;;  %v2245_v9 = vld [vmem:[%s3949_s0 + $0xf0] sm:$0xff] }
 0x238   :  { %v3415_v12 = vpop.permute.xlu1 %1167  ;;  %v3417_v29 = vpop.permute.xlu0 %1179 }
 0x239   :  { %4164 = vst [vmem:[#allocation133_spill] sm:$0xff] %v3415_v12  ;;  %4165 = vst [vmem:[#allocation134_spill] sm:$0xff] %v3417_v29 }
 0x23a   :  { %1402 = vperm.xlu1 %2151, %v2244_v35   ;;  %1507 = vperm.xlu0 %2156, %v2712_v24  }
 0x23c   :  { %v3423_v49 = vpop.permute.xlu1 %1175  ;;  %v3425_v19 = vpop.permute.xlu0 %1187 }
 0x23d   :  { %4166 = vst [vmem:[#allocation135_spill] sm:$0xff] %v3423_v49  ;;  %4167 = vst [vmem:[#allocation136_spill] sm:$0xff] %v3425_v19  ;;  %v2248_v49 = vld [vmem:[%s3949_s0 + $0xd8] sm:$0xff] }
 0x23e   :  { %1551 = vperm.xlu1 %2151, %v2755_v53   ;;  %1417 = vperm.xlu0 %2156, %v2245_v9   ;;  %v4171_v53 = vld [vmem:[#allocation14_spill] sm:$0xff] }
 0x240   :  { %v3431_v18 = vpop.permute.xlu1 %1183  ;;  %v3433_v29 = vpop.permute.xlu0 %1195 }
 0x241   :  { %4168 = vst [vmem:[#allocation137_spill] sm:$0xff] %v3431_v18  ;;  %4169 = vst [vmem:[#allocation138_spill] sm:$0xff] %v3433_v29 }
 0x242   :  { %1555 = vperm.xlu1 %2151, %v4161_v15   ;;  %1511 = vperm.xlu0 %2156, %v2715_v11   ;;  %v2246_v15 = vld [vmem:[%s3949_s0 + $0x50] sm:$0xff] }
 0x244   :  { %v3437_v24 = vpop.permute.xlu1 %1191  ;;  %v3439_v35 = vpop.permute.xlu0 %1203 }
 0x245   :  { %4170 = vst [vmem:[#allocation139_spill] sm:$0xff] %v3437_v24 }
 0x246   :  { %2152 = vset.pattern.permute.xlu1 %v4140_v28  ;;  %1515 = vperm.xlu0 %2156, %v2720_v30   ;;  %v2247_v30 = vld [vmem:[%s3949_s0 + $0x58] sm:$0xff] }
 0x247   :  { %1243 = vperm.xlu1 %2152, %v4171_v53  }
 0x248   :  { %v1200_v19 = vpop.permute.xlu1 %1199  ;;  %v3444_v9 = vpop.permute.xlu0 %1215 }
 0x24b   :  { %2153 = vset.pattern.permute.xlu1 %v4139_v5 }
 0x24c   :  { %1357 = vperm.xlu1 %2153, %v2246_v15   ;;  %v3450_v11 = vpop.permute.xlu1 %1207  ;;  %v3452_v29 = vpop.permute.xlu0 %1223  ;;  %v332_v15 = vlaneseq }
 0x24d   :  { %4172 = vst [vmem:[#allocation14_spill] sm:$0xff] %v3452_v29 }
 0x24e   :  { %v3469_v29 = vand.u32 127, %v332_v15 }
 0x250   :  { %1360 = vperm.xlu1 %2153, %v2247_v30   ;;  %v3457_v24 = vpop.permute.xlu0 %1231  ;;  %vm783_vm0 = vcmp.eq.s32.totalorder %v3469_v29, %v4176_v22  ;;  %vm782_vm4 = vcmp.eq.s32.totalorder %v3469_v29, %v4178_v45  ;;  %vm1102_vm5 = vcmp.eq.s32.totalorder %v3469_v29, %v3260_v50  ;;  %v4181_v22 = vld [vmem:[#allocation16_spill] sm:$0xff]  ;;  %vm1103_vm7 = vcmp.eq.s32.totalorder %v3469_v29, %v3269_v20  ;;  %v4182_v50 = vld [vmem:[#allocation15_spill] sm:$0xff] }
 0x251   :  { %4173 = vst [vmem:[#allocation140_spill] sm:$0xff] %v3457_v24  ;;  %v3459_v18 = vpop.permute.xlu1 %1375  ;;  %v4177_v24 = vld [vmem:[#allocation13_spill] sm:$0xff]  ;;  %v1262_v45 = vsel %vm1102_vm5, %v3384_v48, 0.0  ;;  %vm798_vm10 = vcmp.eq.s32.totalorder %v3469_v29, %v3063_v21  ;;  %vm1118_vm12 = vcmp.eq.s32.totalorder %v3469_v29, %v3324_v46  ;;  %v2249_v21 = vld [vmem:[%s3949_s0 + $0x60] sm:$0xff]  ;;  %vm799_vm13 = vcmp.eq.s32.totalorder %v3469_v29, %v3067_v26  ;;  %v4186_v46 = vld [vmem:[#allocation35_spill] sm:$0xff] }
 0x252   :  { %vm430_vm3 = vcmp.eq.s32.totalorder %v3469_v29, %v4177_v24  ;;  %vm448_vm14 = vcmp.eq.s32.totalorder %v3469_v29, %v4186_v46  ;;  %vm800_vm1 = vcmp.eq.s32.totalorder %v3469_v29, %v3069_v27  ;;  %vm1119_vm2 = vcmp.eq.s32.totalorder %v3469_v29, %v3318_v4 }
 0x253   :  { %v622_v24 = vsel %vm430_vm3, %v4181_v22, 0.0  ;;  %vm1120_vm3 = vcmp.eq.s32.totalorder %v3469_v29, %v3330_v23  ;;  %vm801_vm5 = vcmp.eq.s32.totalorder %v3469_v29, %v3073_v32 }
 0x254   :  { %1408 = vperm.xlu1 %2153, %v2248_v49   ;;  %v3464_v12 = vpop.permute.xlu0 %1239  ;;  %v942_v49 = vsel %vm782_vm4, %v3111_v47, 0.0  ;;  %v961_v23 = vsel %vm801_vm5, %v3181_v61, 0.0 }
 0x255   :  { %4174 = vst [vmem:[#allocation141_spill] sm:$0xff] %v3464_v12  ;;  %v1331_v36 = vpop.permute.xlu1 %1330  ;;  %v4180_v12 = vld [vmem:[#allocation6_spill] sm:$0xff] }
 0x256   :  { %vm431_vm6 = vcmp.eq.s32.totalorder %v3469_v29, %v4180_v12  ;;  %vm1423_vm8 = vcmp.eq.s32.totalorder %v3469_v29, %v1331_v36  ;;  %v4185_v36 = vld [vmem:[#allocation54_spill] sm:$0xff] }
 0x257   :  { %v623_v39 = vsel %vm431_vm6, %v4182_v50, 0.0  ;;  %v4184_v50 = vld [vmem:[#allocation34_spill] sm:$0xff] }
 0x258   :  { %1559 = vperm.xlu1 %2153, %v2765_v37   ;;  %v3467_v63 = vpop.permute.xlu0 %1247  ;;  %vm446_vm11 = vcmp.eq.s32.totalorder %v3469_v29, %v4184_v50 }
 0x259   :  { %4175 = vst [vmem:[#allocation142_spill] sm:$0xff] %v3467_v63  ;;  %v1456_v30 = vpop.permute.xlu1 %1455  ;;  %v943_v63 = vsel %vm783_vm0, %v3115_v52, 0.0  ;;  %v4183_v52 = vld [vmem:[#allocation18_spill] sm:$0xff]  ;;  %vm1438_vm0 = vcmp.eq.s32.totalorder %v3469_v29, %v3459_v18 }
 0x25a   :  { %v975_v47 = vadd.f32 %v943_v63, %v623_v39 }
 0x25c   :  { %1563 = vperm.xlu1 %2153, %v4171_v53   ;;  %v3480_v37 = vpop.permute.xlu0 %1255  ;;  %v974_v53 = vadd.f32 %v942_v49, %v622_v24 }
 0x25d   :  { %4179 = vst [vmem:[#allocation72_spill] sm:$0xff] %v3480_v37  ;;  %v1460_v15 = vpop.permute.xlu1 %1459  ;;  %v1263_v37 = vsel %vm1103_vm7, %v3378_v7, 0.0  ;;  %v958_v7 = vsel %vm798_vm10, %v3159_v51, 0.0  ;;  %vm1121_vm7 = vcmp.eq.s32.totalorder %v3469_v29, %v3326_v59 }
 0x25e   :  { %v1583_v56 = vsel %vm1423_vm8, %v1460_v15, 0.0  ;;  %v1294_v20 = vadd.f32 %v1262_v45, %v974_v53  ;;  %v1295_v48 = vadd.f32 %v1263_v37, %v975_v47  ;;  %v638_v15 = vsel %vm446_vm11, %v4185_v36, 0.0  ;;  %v4188_v53 = vld [vmem:[#allocation57_spill] sm:$0xff] }
 0x25f   :  { %v1278_v45 = vsel %vm1118_vm12, %v1200_v19, 0.0  ;;  %v990_v51 = vadd.f32 %v958_v7, %v638_v15  ;;  %v959_v19 = vsel %vm799_vm13, %v3169_v43, 0.0  ;;  %v2250_v43 = vld [vmem:[%s3949_s0 + $0x68] sm:$0xff]  ;;  %vm1104_vm12 = vcmp.eq.s32.totalorder %v3469_v29, %v3277_v57 }
 0x260   :  { %2154 = vset.pattern.permute.xlu1 %v4140_v28  ;;  %v1615_v39 = vadd.f32 %v1583_v56, %v1295_v48  ;;  %v4187_v56 = vld [vmem:[#allocation31_spill] sm:$0xff]  ;;  %v2251_v36 = vld [vmem:[%s3949_s0 + $0xe8] sm:$0xff] }
 0x261   :  { %1251 = vperm.xlu1 %2154, %v4183_v52   ;;  %v1328_v12 = vpop.permute.xlu0 %1327  ;;  %vm447_vm15 = vcmp.eq.s32.totalorder %v3469_v29, %v4187_v56  ;;  %v1310_v37 = vadd.f32 %v1278_v45, %v990_v51  ;;  %v4191_v45 = vld [vmem:[#allocation59_spill] sm:$0xff] }
 0x262   :  { %vm1422_vm9 = vcmp.eq.s32.totalorder %v3469_v29, %v1328_v12  ;;  %v1212_v22 = vpop.permute.xlu1 %1211  ;;  %v639_v47 = vsel %vm447_vm15, %v4188_v53, 0.0  ;;  %v960_v12 = vsel %vm800_vm1, %v3171_v14, 0.0 }
 0x263   :  { %v1582_v49 = vsel %vm1422_vm9, %v1456_v30, 0.0  ;;  %v991_v27 = vadd.f32 %v959_v19, %v639_v47  ;;  %v1281_v51 = vsel %vm1121_vm7, %v1212_v22, 0.0  ;;  %v4193_v47 = vld [vmem:[#allocation10_spill] sm:$0xff]  ;;  %vm802_vm7 = vcmp.eq.s32.totalorder %v3469_v29, %v3075_v33 }
 0x264   :  { %v1614_v24 = vadd.f32 %v1582_v49, %v1294_v20  ;;  %v1279_v20 = vsel %vm1119_vm2, %v3439_v35, 0.0  ;;  %v4189_v49 = vld [vmem:[#allocation56_spill] sm:$0xff]  ;;  %v1280_v35 = vsel %vm1120_vm3, %v3450_v11, 0.0  ;;  %vm432_vm11 = vcmp.eq.s32.totalorder %v3469_v29, %v4193_v47 }
 0x265   :  { %2155 = vset.pattern.permute.xlu1 %v4139_v5  ;;  %v1379_v63 = vpop.permute.xlu0 %1378  ;;  %v640_v14 = vsel %vm448_vm14, %v4189_v49, 0.0  ;;  %vm1105_vm14 = vcmp.eq.s32.totalorder %v3469_v29, %v3271_v16 }
 0x266   :  { %1363 = vperm.xlu1 %2155, %v2249_v21   ;;  %2036 = vmatprep.mubr.f32.mxu0 %v1614_v24  ;;  %vm1439_vm4 = vcmp.eq.s32.totalorder %v3469_v29, %v1379_v63  ;;  %v992_v7 = vadd.f32 %v960_v12, %v640_v14  ;;  %v1311_v24 = vadd.f32 %v1279_v20, %v991_v27  ;;  %v1265_v14 = vsel %vm1105_vm14, %v3386_v8, 0.0 }
 0x267   :  { %v1382_v30 = vpop.permute.xlu1 %1381  ;;  %2037 = vmatmul.mubr.f32.vlgmr.msra.gmra.mrb[0].mxu0 %v1615_v39  ;;  %v4190_v39 = vld [vmem:[#allocation33_spill] sm:$0xff] }
 0x268   :  { %vm449_vm6 = vcmp.eq.s32.totalorder %v3469_v29, %v4190_v39  ;;  %v1312_v11 = vadd.f32 %v1280_v35, %v992_v7  ;;  %vm1440_vm8 = vcmp.eq.s32.totalorder %v3469_v29, %v1382_v30 }
 0x269   :  { %v1520_v26 = vpop.permute.xlu0 %1519  ;;  %v641_v21 = vsel %vm449_vm6, %v4191_v45, 0.0  ;;  %v4201_v45 = vld [vmem:[#allocation22_spill] sm:$0xff] }
 0x26a   :  { %v1598_v48 = vsel %vm1438_vm0, %v1520_v26, 0.0  ;;  %1366 = vperm.xlu1 %2155, %v2250_v43   ;;  %v993_v56 = vadd.f32 %v961_v23, %v641_v21  ;;  %v4195_v43 = vld [vmem:[#allocation73_spill] sm:$0xff]  ;;  %vm435_vm5 = vcmp.eq.s32.totalorder %v3469_v29, %v4201_v45 }
 0x26b   :  { %v1385_v4 = vpop.permute.xlu1 %1384  ;;  %v1630_v18 = vadd.f32 %v1598_v48, %v1310_v37  ;;  %v4192_v37 = vld [vmem:[#allocation71_spill] sm:$0xff]  ;;  %v1264_v48 = vsel %vm1104_vm12, %v3390_v10, 0.0  ;;  %vm785_vm13 = vcmp.eq.s32.totalorder %v3469_v29, %v4195_v43  ;;  %vm803_vm12 = vcmp.eq.s32.totalorder %v3469_v29, %v3079_v38  ;;  %v4208_v43 = vld [vmem:[#allocation61_spill] sm:$0xff] }
 0x26c   :  { %vm784_vm9 = vcmp.eq.s32.totalorder %v3469_v29, %v4192_v37  ;;  %v1313_v26 = vadd.f32 %v1281_v51, %v993_v56  ;;  %vm1441_vm10 = vcmp.eq.s32.totalorder %v3469_v29, %v1385_v4  ;;  %v4196_v4 = vld [vmem:[#allocation17_spill] sm:$0xff]  ;;  %v4203_v51 = vld [vmem:[#allocation75_spill] sm:$0xff]  ;;  %v962_v37 = vsel %vm802_vm7, %v3183_v6, 0.0 }
 0x26d   :  { %2060 = vmatprep.mubr.f32.mxu1 %v1630_v18  ;;  %v1524_v50 = vpop.permute.xlu0 %1523  ;;  %v944_v30 = vsel %vm784_vm9, %v3117_v1, 0.0  ;;  %v945_v1 = vsel %vm785_vm13, %v3121_v54, 0.0  ;;  %vm433_vm1 = vcmp.eq.s32.totalorder %v3469_v29, %v4196_v4  ;;  %v4199_v54 = vld [vmem:[#allocation74_spill] sm:$0xff]  ;;  %vm787_vm6 = vcmp.eq.s32.totalorder %v3469_v29, %v4203_v51  ;;  %v4205_v56 = vld [vmem:[#allocation45_spill] sm:$0xff] }
 0x26e   :  { %v1599_v63 = vsel %vm1439_vm4, %v1524_v50, 0.0  ;;  %1414 = vperm.xlu1 %2155, %v2251_v36   ;;  %vm786_vm0 = vcmp.eq.s32.totalorder %v3469_v29, %v4199_v54  ;;  %vm1106_vm4 = vcmp.eq.s32.totalorder %v3469_v29, %v3283_v31  ;;  %v4204_v31 = vld [vmem:[#allocation37_spill] sm:$0xff] }
 0x26f   :  { %v1631_v32 = vadd.f32 %v1599_v63, %v1311_v24  ;;  %v1528_v15 = vpop.permute.xlu1 %1527  ;;  %v4198_v24 = vld [vmem:[#allocation21_spill] sm:$0xff]  ;;  %v946_v8 = vsel %vm786_vm0, %v3123_v58, 0.0  ;;  %v1266_v58 = vsel %vm1106_vm4, %v3396_v13, 0.0  ;;  %vm450_vm9 = vcmp.eq.s32.totalorder %v3469_v29, %v4204_v31  ;;  %v2253_v13 = vld [vmem:[%s3949_s0 + $0x78] sm:$0xff] }
 0x270   :  { %v1600_v46 = vsel %vm1440_vm8, %v1528_v15, 0.0  ;;  %vm1107_vm8 = vcmp.eq.s32.totalorder %v3469_v29, %v3279_v44  ;;  %vm1108_vm4 = vcmp.eq.s32.totalorder %v3469_v29, %v3289_v34  ;;  %v4214_v34 = vld [vmem:[#allocation47_spill] sm:$0xff]  ;;  %v4217_v31 = vld [vmem:[#allocation105_spill] sm:$0xff] }
 0x271   :  { %v1632_v61 = vadd.f32 %v1600_v46, %v1312_v11  ;;  %2061 = vmatmul.mubr.f32.vlgmr.msra.gmra.mrb[0].mxu1 %v1631_v32  ;;  %v1334_v19 = vpop.permute.xlu0 %1333  ;;  %v4200_v11 = vld [vmem:[#allocation19_spill] sm:$0xff]  ;;  %v1267_v6 = vsel %vm1107_vm8, %v3392_v25, 0.0 }
 0x272   :  { %1567 = vperm.xlu1 %2155, %v2777_v40   ;;  %v4194_v40 = vld [vmem:[#allocation12_spill] sm:$0xff]  ;;  %vm1424_vm15 = vcmp.eq.s32.totalorder %v3469_v29, %v1334_v19  ;;  %vm434_vm3 = vcmp.eq.s32.totalorder %v3469_v29, %v4200_v11  ;;  %v947_v19 = vsel %vm787_vm6, %v3127_v0, 0.0  ;;  %vm1109_vm6 = vcmp.eq.s32.totalorder %v3469_v29, %v3285_v3 }
 0x273   :  { %v1532_v59 = vpop.permute.xlu1 %1531  ;;  %2063 = vmatprep.mubr.f32.mxu1 %v1632_v61  ;;  %v624_v20 = vsel %vm432_vm11, %v4194_v40, 0.0  ;;  %v627_v61 = vsel %vm435_vm5, %v4205_v56, 0.0  ;;  %v4207_v40 = vld [vmem:[#allocation36_spill] sm:$0xff] }
 0x274   :  { %v1601_v53 = vsel %vm1441_vm10, %v1532_v59, 0.0  ;;  %v976_v27 = vadd.f32 %v944_v30, %v624_v20  ;;  %vm1122_vm10 = vcmp.eq.s32.totalorder %v3469_v29, %v3338_v41  ;;  %v979_v47 = vadd.f32 %v947_v19, %v627_v61  ;;  %v2254_v20 = vld [vmem:[%s3949_s0 + $0xf8] sm:$0xff] }
 0x275   :  { %v1633_v22 = vadd.f32 %v1601_v53, %v1313_v26  ;;  %v1337_v12 = vpop.permute.xlu0 %1336  ;;  %v4206_v26 = vld [vmem:[#allocation58_spill] sm:$0xff]  ;;  %v1282_v0 = vsel %vm1122_vm10, %v3444_v9, 0.0  ;;  %vm451_vm14 = vcmp.eq.s32.totalorder %v3469_v29, %v4207_v40  ;;  %v963_v41 = vsel %vm803_vm12, %v3193_v60, 0.0  ;;  %v4218_v19 = vld [vmem:[#allocation39_spill] sm:$0xff] }
 0x276   :  { %1571 = vperm.xlu1 %2155, %v4183_v52   ;;  %v1296_v10 = vadd.f32 %v1264_v48, %v976_v27  ;;  %v4197_v52 = vld [vmem:[#allocation43_spill] sm:$0xff]  ;;  %vm1425_vm2 = vcmp.eq.s32.totalorder %v3469_v29, %v1337_v12  ;;  %v642_v33 = vsel %vm450_vm9, %v4206_v26, 0.0  ;;  %v1299_v38 = vadd.f32 %v1267_v6, %v979_v47  ;;  %v4220_v26 = vld [vmem:[#allocation60_spill] sm:$0xff]  ;;  %v4224_v47 = vld [vmem:[#allocation38_spill] sm:$0xff] }
 0x277   :  { %2064 = vmatmul.mubr.f32.gmra.mrb[2].mxu1 %v1633_v22  ;;  %v625_v49 = vsel %vm433_vm1, %v4197_v52, 0.0  ;;  %v994_v22 = vadd.f32 %v962_v37, %v642_v33  ;;  %v643_v27 = vsel %vm451_vm14, %v4208_v43, 0.0  ;;  %v4219_v37 = vld [vmem:[#allocation124_spill] sm:$0xff] }
 0x278   :  { %v3565_v57 = vpop.permute.xlu1 %1219  ;;  %v977_v16 = vadd.f32 %v945_v1, %v625_v49  ;;  %vm1124_vm12 = vcmp.eq.s32.totalorder %v3469_v29, %v4219_v37 }
 0x279   :  { %v1464_v18 = vpop.permute.xlu0 %1463  ;;  %v1314_v25 = vadd.f32 %v1282_v0, %v994_v22  ;;  %v4223_v0 = vld [vmem:[#allocation106_spill] sm:$0xff]  ;;  %v4225_v22 = vld [vmem:[#allocation123_spill] sm:$0xff] }
 0x27a   :  { %v1584_v35 = vsel %vm1424_vm15, %v1464_v18, 0.0  ;;  %2157 = vset.pattern.permute.xlu1 %v4140_v28  ;;  %v1297_v50 = vadd.f32 %v1265_v14, %v977_v16  ;;  %v2252_v28 = vld [vmem:[%s3949_s0 + $0x70] sm:$0xff]  ;;  %vm1123_vm15 = vcmp.eq.s32.totalorder %v3469_v29, %v3332_v62  ;;  %v4209_v16 = vld [vmem:[#allocation76_spill] sm:$0xff] }
 0x27b   :  { %v1616_v7 = vadd.f32 %v1584_v35, %v1296_v10  ;;  %1259 = vperm.xlu1 %2157, %v4198_v24   ;;  %v1283_v1 = vsel %vm1123_vm15, %v3565_v57, 0.0  ;;  %v995_v10 = vadd.f32 %v963_v41, %v643_v27  ;;  %vm788_vm0 = vcmp.eq.s32.totalorder %v3469_v29, %v4209_v16  ;;  %v4226_v41 = vld [vmem:[#allocation62_spill] sm:$0xff] }
 0x27c   :  { %v948_v54 = vsel %vm788_vm0, %v3129_v55, 0.0  ;;  %vm453_vm15 = vcmp.eq.s32.totalorder %v3469_v29, %v4224_v47 }
 0x27d   :  { %v1340_v39 = vpop.permute.xlu1 %1339  ;;  %2039 = vmatprep.mubr.f32.mxu0 %v1616_v7  ;;  %v1468_v23 = vpop.permute.xlu0 %1467  ;;  %v1315_v49 = vadd.f32 %v1283_v1, %v995_v10 }
 0x27e   :  { %v1585_v63 = vsel %vm1425_vm2, %v1468_v23, 0.0  ;;  %vm1426_vm11 = vcmp.eq.s32.totalorder %v3469_v29, %v1340_v39  ;;  %v1268_v23 = vsel %vm1108_vm4, %v3407_v42, 0.0  ;;  %v4215_v42 = vld [vmem:[#allocation11_spill] sm:$0xff] }
 0x27f   :  { %v1617_v36 = vadd.f32 %v1585_v63, %v1297_v50  ;;  %2158 = vset.pattern.permute.xlu1 %v4139_v5  ;;  %v4202_v5 = vld [vmem:[#allocation42_spill] sm:$0xff]  ;;  %v4210_v50 = vld [vmem:[#allocation24_spill] sm:$0xff]  ;;  %v4212_v63 = vld [vmem:[#allocation77_spill] sm:$0xff] }
 0x280   :  { %1369 = vperm.xlu1 %2158, %v2252_v28   ;;  %v626_v21 = vsel %vm434_vm3, %v4202_v5, 0.0  ;;  %vm436_vm3 = vcmp.eq.s32.totalorder %v3469_v29, %v4210_v50  ;;  %vm789_vm5 = vcmp.eq.s32.totalorder %v3469_v29, %v4212_v63  ;;  %v4213_v28 = vld [vmem:[#allocation25_spill] sm:$0xff]  ;;  %v4234_v50 = vld [vmem:[#allocation80_spill] sm:$0xff] }
 0x281   :  { %v1343_v32 = vpop.permute.xlu1 %1342  ;;  %2040 = vmatmul.mubr.f32.gmra.mrb[2].mxu0 %v1617_v36  ;;  %v1388_v15 = vpop.permute.xlu0 %1387  ;;  %v978_v46 = vadd.f32 %v946_v8, %v626_v21  ;;  %v949_v55 = vsel %vm789_vm5, %v3133_v2, 0.0  ;;  %vm437_vm7 = vcmp.eq.s32.totalorder %v3469_v29, %v4213_v28  ;;  %v4216_v2 = vld [vmem:[#allocation87_spill] sm:$0xff] }
 0x282   :  { %vm1442_vm13 = vcmp.eq.s32.totalorder %v3469_v29, %v1388_v15  ;;  %vm1427_vm1 = vcmp.eq.s32.totalorder %v3469_v29, %v1343_v32  ;;  %v629_v32 = vsel %vm437_vm7, %v4214_v34, 0.0  ;;  %v1269_v15 = vsel %vm1109_vm6, %v4215_v42, 0.0 }
 0x283   :  { %v1298_v59 = vadd.f32 %v1266_v58, %v978_v46  ;;  %v981_v5 = vadd.f32 %v949_v55, %v629_v32  ;;  %vm804_vm10 = vcmp.eq.s32.totalorder %v3469_v29, %v4216_v2  ;;  %vm791_vm6 = vcmp.eq.s32.totalorder %v3469_v29, %v4234_v50  ;;  %v4258_v50 = vld [vmem:[#allocation100_spill] sm:$0xff] }
 0x284   :  { %1372 = vperm.xlu1 %2158, %v2253_v13   ;;  %v964_v56 = vsel %vm804_vm10, %v4217_v31, 0.0  ;;  %v4241_v31 = vld [vmem:[#allocation40_spill] sm:$0xff] }
 0x285   :  { %v1391_v44 = vpop.permute.xlu1 %1390  ;;  %v1472_v30 = vpop.permute.xlu0 %1471  ;;  %v1301_v51 = vadd.f32 %v1269_v15, %v981_v5 }
 0x286   :  { %v1586_v53 = vsel %vm1426_vm11, %v1472_v30, 0.0  ;;  %vm1443_vm2 = vcmp.eq.s32.totalorder %v3469_v29, %v1391_v44  ;;  %vm452_vm11 = vcmp.eq.s32.totalorder %v3469_v29, %v4218_v19  ;;  %v4222_v30 = vld [vmem:[#allocation88_spill] sm:$0xff]  ;;  %v4243_v19 = vld [vmem:[#allocation7_spill] sm:$0xff] }
 0x287   :  { %v1618_v12 = vadd.f32 %v1586_v53, %v1298_v59  ;;  %v644_v33 = vsel %vm452_vm11, %v4220_v26, 0.0  ;;  %v4221_v59 = vld [vmem:[#allocation14_spill] sm:$0xff]  ;;  %vm454_vm11 = vcmp.eq.s32.totalorder %v3469_v29, %v4241_v31  ;;  %v4266_v31 = vld [vmem:[#allocation63_spill] sm:$0xff] }
 0x288   :  { %1420 = vperm.xlu1 %2158, %v2254_v20   ;;  %v1284_v44 = vsel %vm1124_vm12, %v4221_v59, 0.0  ;;  %v996_v6 = vadd.f32 %v964_v56, %v644_v33  ;;  %v645_v20 = vsel %vm453_vm15, %v4226_v41, 0.0  ;;  %v4242_v56 = vld [vmem:[#allocation79_spill] sm:$0xff]  ;;  %v646_v37 = vsel %vm454_vm11, %v4243_v19, 0.0  ;;  %v4245_v33 = vld [vmem:[#allocation90_spill] sm:$0xff] }
 0x289   :  { %v1536_v9 = vpop.permute.xlu1 %1535  ;;  %2042 = vmatprep.mubr.f32.mxu0 %v1618_v12  ;;  %v1476_v48 = vpop.permute.xlu0 %1475  ;;  %vm1126_vm12 = vcmp.eq.s32.totalorder %v3469_v29, %v4242_v56 }
 0x28a   :  { %v1602_v60 = vsel %vm1442_vm13, %v1536_v9, 0.0  ;;  %v1587_v4 = vsel %vm1427_vm1, %v1476_v48, 0.0  ;;  %vm805_vm13 = vcmp.eq.s32.totalorder %v3469_v29, %v4222_v30  ;;  %vm1125_vm1 = vcmp.eq.s32.totalorder %v3469_v29, %v4225_v22  ;;  %v4249_v22 = vld [vmem:[#allocation64_spill] sm:$0xff] }
 0x28b   :  { %v1634_v18 = vadd.f32 %v1602_v60, %v1314_v25  ;;  %v1619_v52 = vadd.f32 %v1587_v4, %v1299_v38  ;;  %v965_v53 = vsel %vm805_vm13, %v4223_v0, 0.0  ;;  %v1316_v12 = vadd.f32 %v1284_v44, %v996_v6  ;;  %v4227_v4 = vld [vmem:[#allocation78_spill] sm:$0xff]  ;;  %v4246_v44 = vld [vmem:[#allocation108_spill] sm:$0xff]  ;;  %v4247_v6 = vld [vmem:[#allocation41_spill] sm:$0xff] }
 0x28c   :  { %1575 = vperm.xlu1 %2158, %v2787_v17   ;;  %v4211_v17 = vld [vmem:[#allocation44_spill] sm:$0xff]  ;;  %v997_v9 = vadd.f32 %v965_v53, %v645_v20  ;;  %vm790_vm0 = vcmp.eq.s32.totalorder %v3469_v29, %v4227_v4  ;;  %vm807_vm13 = vcmp.eq.s32.totalorder %v3469_v29, %v4245_v33  ;;  %v4248_v0 = vld [vmem:[#allocation125_spill] sm:$0xff]  ;;  %v4251_v4 = vld [vmem:[#allocation99_spill] sm:$0xff] }
 0x28d   :  { %v1540_v62 = vpop.permute.xlu1 %1539  ;;  %2043 = vmatmul.mubr.f32.gmra.mrb[4].mxu0 %v1619_v52  ;;  %2066 = vmatprep.mubr.f32.mxu1 %v1634_v18  ;;  %v1394_v7 = vpop.permute.xlu0 %1393  ;;  %v628_v39 = vsel %vm436_vm3, %v4211_v17, 0.0  ;;  %v4228_v52 = vld [vmem:[#allocation97_spill] sm:$0xff]  ;;  %v967_v30 = vsel %vm807_vm13, %v4246_v44, 0.0  ;;  %vm1127_vm15 = vcmp.eq.s32.totalorder %v3469_v29, %v4248_v0  ;;  %v4271_v44 = vld [vmem:[#allocation126_spill] sm:$0xff] }
 0x28e   :  { %v1603_v14 = vsel %vm1443_vm2, %v1540_v62, 0.0  ;;  %v980_v36 = vadd.f32 %v948_v54, %v628_v39  ;;  %vm1444_vm14 = vcmp.eq.s32.totalorder %v3469_v29, %v1394_v7  ;;  %v4229_v62 = vld [vmem:[#allocation27_spill] sm:$0xff]  ;;  %v4232_v7 = vld [vmem:[#allocation133_spill] sm:$0xff]  ;;  %v4233_v54 = vld [vmem:[#allocation20_spill] sm:$0xff] }
 0x28f   :  { %v1635_v35 = vadd.f32 %v1603_v14, %v1315_v49  ;;  %v950_v49 = vsel %vm790_vm0, %v4228_v52, 0.0  ;;  %vm438_vm3 = vcmp.eq.s32.totalorder %v3469_v29, %v4229_v62  ;;  %v4230_v14 = vld [vmem:[#allocation116_spill] sm:$0xff]  ;;  %vm439_vm5 = vcmp.eq.s32.totalorder %v3469_v29, %v4233_v54  ;;  %v4252_v52 = vld [vmem:[#allocation29_spill] sm:$0xff]  ;;  %v4272_v0 = vld [vmem:[#allocation66_spill] sm:$0xff] }
 0x290   :  { %1579 = vperm.xlu1 %2158, %v4198_v24   ;;  %v1300_v11 = vadd.f32 %v1268_v23, %v980_v36  ;;  %vm1110_vm4 = vcmp.eq.s32.totalorder %v3469_v29, %v4230_v14  ;;  %v4235_v23 = vld [vmem:[#allocation98_spill] sm:$0xff]  ;;  %v4255_v14 = vld [vmem:[#allocation135_spill] sm:$0xff] }
 0x291   :  { %2067 = vmatmul.mubr.f32.gmra.mrb[4].mxu1 %v1635_v35  ;;  %v1480_v24 = vpop.permute.xlu0 %1479  ;;  %v4231_v35 = vld [vmem:[#allocation46_spill] sm:$0xff]  ;;  %v951_v63 = vsel %vm791_vm6, %v4235_v23, 0.0  ;;  %v4259_v23 = vld [vmem:[#allocation117_spill] sm:$0xff] }
 0x292   :  { %v1228_v57 = vpop.permute.xlu1 %1227  ;;  %v630_v16 = vsel %vm438_vm3, %v4231_v35, 0.0  ;;  %vm440_vm3 = vcmp.eq.s32.totalorder %v3469_v29, %v4252_v52 }
 0x293   :  { %v1285_v38 = vsel %vm1125_vm1, %v1228_v57, 0.0  ;;  %v1270_v57 = vsel %vm1110_vm4, %v4232_v7, 0.0  ;;  %v982_v17 = vadd.f32 %v950_v49, %v630_v16  ;;  %v4254_v49 = vld [vmem:[#allocation48_spill] sm:$0xff]  ;;  %v4256_v16 = vld [vmem:[#allocation23_spill] sm:$0xff]  ;;  %v4257_v7 = vld [vmem:[#allocation82_spill] sm:$0xff] }
 0x294   :  { %v1317_v43 = vadd.f32 %v1285_v38, %v997_v9  ;;  %v632_v62 = vsel %vm440_vm3, %v4254_v49, 0.0  ;;  %vm793_vm6 = vcmp.eq.s32.totalorder %v3469_v29, %v4257_v7  ;;  %v4281_v7 = vld [vmem:[#allocation102_spill] sm:$0xff] }
 0x295   :  { %v1484_v3 = vpop.permute.xlu0 %1483  ;;  %v1302_v55 = vadd.f32 %v1270_v57, %v982_v17  ;;  %v953_v17 = vsel %vm793_vm6, %v4258_v50, 0.0  ;;  %v4282_v50 = vld [vmem:[#allocation119_spill] sm:$0xff] }
 0x297   :  { %v1346_v8 = vpop.permute.xlu1 %1345 }
 0x298   :  { %vm1428_vm8 = vcmp.eq.s32.totalorder %v3469_v29, %v1346_v8  ;;  %v4237_v8 = vld [vmem:[#allocation49_spill] sm:$0xff] }
 0x299   :  { %v1588_v45 = vsel %vm1428_vm8, %v1480_v24, 0.0  ;;  %v1400_v10 = vpop.permute.xlu0 %1399  ;;  %v4236_v24 = vld [vmem:[#allocation115_spill] sm:$0xff]  ;;  %v631_v28 = vsel %vm439_vm5, %v4237_v8, 0.0  ;;  %vm441_vm5 = vcmp.eq.s32.totalorder %v3469_v29, %v4256_v16 }
 0x29a   :  { %v1620_v21 = vadd.f32 %v1588_v45, %v1300_v11  ;;  %vm1111_vm7 = vcmp.eq.s32.totalorder %v3469_v29, %v4236_v24  ;;  %v4238_v11 = vld [vmem:[#allocation132_spill] sm:$0xff]  ;;  %v983_v42 = vadd.f32 %v951_v63, %v631_v28  ;;  %vm1446_vm1 = vcmp.eq.s32.totalorder %v3469_v29, %v1400_v10 }
 0x29b   :  { %v1349_v58 = vpop.permute.xlu1 %1348  ;;  %v1271_v34 = vsel %vm1111_vm7, %v4238_v11, 0.0  ;;  %vm1113_vm7 = vcmp.eq.s32.totalorder %v3469_v29, %v4259_v23 }
 0x29c   :  { %vm1429_vm9 = vcmp.eq.s32.totalorder %v3469_v29, %v1349_v58  ;;  %2045 = vmatprep.mubr.f32.mxu0 %v1620_v21  ;;  %v1303_v5 = vadd.f32 %v1271_v34, %v983_v42  ;;  %v4239_v58 = vld [vmem:[#allocation89_spill] sm:$0xff] }
 0x29d   :  { %v1589_v46 = vsel %vm1429_vm9, %v1484_v3, 0.0  ;;  %v1488_v39 = vpop.permute.xlu0 %1487  ;;  %vm806_vm10 = vcmp.eq.s32.totalorder %v3469_v29, %v4239_v58  ;;  %v4240_v3 = vld [vmem:[#allocation107_spill] sm:$0xff] }
 0x29e   :  { %v1621_v61 = vadd.f32 %v1589_v46, %v1301_v51  ;;  %v966_v2 = vsel %vm806_vm10, %v4240_v3, 0.0  ;;  %v4264_v3 = vld [vmem:[#allocation2_spill] sm:$0xff] }
 0x29f   :  { %v1397_v13 = vpop.permute.xlu1 %1396  ;;  %v998_v59 = vadd.f32 %v966_v2, %v646_v37  ;;  %vm456_vm11 = vcmp.eq.s32.totalorder %v3469_v29, %v4264_v3  ;;  %v4265_v2 = vld [vmem:[#allocation127_spill] sm:$0xff]  ;;  %v4268_v37 = vld [vmem:[#allocation92_spill] sm:$0xff]  ;;  %v4289_v3 = vld [vmem:[#allocation65_spill] sm:$0xff] }
 0x2a0   :  { %2046 = vmatmul.mubr.f32.gmra.mrb[6].mxu0 %v1621_v61  ;;  %vm1445_vm2 = vcmp.eq.s32.totalorder %v3469_v29, %v1397_v13  ;;  %v4244_v13 = vld [vmem:[#allocation140_spill] sm:$0xff]  ;;  %v648_v56 = vsel %vm456_vm11, %v4266_v31, 0.0  ;;  %vm809_vm13 = vcmp.eq.s32.totalorder %v3469_v29, %v4268_v37 }
 0x2a1   :  { %v1492_v21 = vpop.permute.xlu0 %1491  ;;  %v1286_v26 = vsel %vm1126_vm12, %v4244_v13, 0.0  ;;  %vm1128_vm12 = vcmp.eq.s32.totalorder %v3469_v29, %v4265_v2 }
 0x2a2   :  { %v1318_v53 = vadd.f32 %v1286_v26, %v998_v59  ;;  %v4269_v26 = vld [vmem:[#allocation110_spill] sm:$0xff]  ;;  %v4270_v59 = vld [vmem:[#allocation5_spill] sm:$0xff] }
 0x2a3   :  { %v1544_v40 = vpop.permute.xlu1 %1543  ;;  %v969_v33 = vsel %vm809_vm13, %v4269_v26, 0.0  ;;  %v4294_v26 = vld [vmem:[#allocation128_spill] sm:$0xff] }
 0x2a4   :  { %v1604_v25 = vsel %vm1444_vm14, %v1544_v40, 0.0  ;;  %vm455_vm14 = vcmp.eq.s32.totalorder %v3469_v29, %v4247_v6 }
 0x2a5   :  { %v1636_v48 = vadd.f32 %v1604_v25, %v1316_v12  ;;  %v647_v12 = vsel %vm455_vm14, %v4249_v22, 0.0  ;;  %vm457_vm14 = vcmp.eq.s32.totalorder %v3469_v29, %v4270_v59 }
 0x2a6   :  { %v999_v20 = vadd.f32 %v967_v30, %v647_v12 }
 0x2a7   :  { %v1548_v27 = vpop.permute.xlu1 %1547  ;;  %2069 = vmatprep.mubr.f32.mxu1 %v1636_v48 }
 0x2a8   :  { %v1605_v1 = vsel %vm1445_vm2, %v1548_v27, 0.0  ;;  %v1406_v27 = vpop.permute.xlu0 %1405 }
 0x2a9   :  { %v1637_v60 = vadd.f32 %v1605_v1, %v1317_v43  ;;  %v4250_v1 = vld [vmem:[#allocation81_spill] sm:$0xff] }
 0x2aa   :  { %vm792_vm0 = vcmp.eq.s32.totalorder %v3469_v29, %v4250_v1 }
 0x2ab   :  { %2070 = vmatmul.mubr.f32.gmra.mrb[6].mxu1 %v1637_v60  ;;  %v952_v10 = vsel %vm792_vm0, %v4251_v4, 0.0  ;;  %v4275_v4 = vld [vmem:[#allocation30_spill] sm:$0xff] }
 0x2ac   :  { %v1236_v18 = vpop.permute.xlu1 %1235  ;;  %v984_v57 = vadd.f32 %v952_v10, %v632_v62  ;;  %v1496_v54 = vpop.permute.xlu0 %1495  ;;  %vm442_vm3 = vcmp.eq.s32.totalorder %v3469_v29, %v4275_v4  ;;  %v4277_v10 = vld [vmem:[#allocation50_spill] sm:$0xff] }
 0x2ad   :  { %v1287_v40 = vsel %vm1127_vm15, %v1236_v18, 0.0  ;;  %v4253_v18 = vld [vmem:[#allocation118_spill] sm:$0xff]  ;;  %vm1129_vm15 = vcmp.eq.s32.totalorder %v3469_v29, %v4271_v44  ;;  %v634_v52 = vsel %vm442_vm3, %v4277_v10, 0.0  ;;  %v4295_v44 = vld [vmem:[#allocation68_spill] sm:$0xff] }
 0x2ae   :  { %v1319_v25 = vadd.f32 %v1287_v40, %v999_v20  ;;  %vm1112_vm4 = vcmp.eq.s32.totalorder %v3469_v29, %v4253_v18  ;;  %v4278_v18 = vld [vmem:[#allocation137_spill] sm:$0xff]  ;;  %v4279_v62 = vld [vmem:[#allocation26_spill] sm:$0xff] }
 0x2af   :  { %v1272_v35 = vsel %vm1112_vm4, %v4255_v14, 0.0  ;;  %v4280_v14 = vld [vmem:[#allocation84_spill] sm:$0xff] }
 0x2b0   :  { %v1304_v63 = vadd.f32 %v1272_v35, %v984_v57  ;;  %vm795_vm6 = vcmp.eq.s32.totalorder %v3469_v29, %v4280_v14 }
 0x2b1   :  { %v1352_v36 = vpop.permute.xlu1 %1351  ;;  %v955_v57 = vsel %vm795_vm6, %v4281_v7, 0.0  ;;  %v4305_v7 = vld [vmem:[#allocation121_spill] sm:$0xff] }
 0x2b2   :  { %vm1430_vm8 = vcmp.eq.s32.totalorder %v3469_v29, %v1352_v36  ;;  %v4260_v36 = vld [vmem:[#allocation51_spill] sm:$0xff] }
 0x2b3   :  { %v1590_v32 = vsel %vm1430_vm8, %v1488_v39, 0.0  ;;  %v633_v24 = vsel %vm441_vm5, %v4260_v36, 0.0  ;;  %vm443_vm5 = vcmp.eq.s32.totalorder %v3469_v29, %v4279_v62  ;;  %v4303_v62 = vld [vmem:[#allocation104_spill] sm:$0xff] }
 0x2b4   :  { %v1622_v15 = vadd.f32 %v1590_v32, %v1302_v55  ;;  %v4261_v55 = vld [vmem:[#allocation134_spill] sm:$0xff]  ;;  %v985_v11 = vadd.f32 %v953_v17, %v633_v24 }
 0x2b5   :  { %v1355_v45 = vpop.permute.xlu1 %1354  ;;  %v1273_v8 = vsel %vm1113_vm7, %v4261_v55, 0.0  ;;  %vm1115_vm7 = vcmp.eq.s32.totalorder %v3469_v29, %v4282_v50 }
 0x2b6   :  { %vm1431_vm9 = vcmp.eq.s32.totalorder %v3469_v29, %v1355_v45  ;;  %2048 = vmatprep.mubr.f32.mxu0 %v1622_v15  ;;  %v1305_v42 = vadd.f32 %v1273_v8, %v985_v11  ;;  %v1500_v15 = vpop.permute.xlu0 %1499  ;;  %v4262_v45 = vld [vmem:[#allocation91_spill] sm:$0xff] }
 0x2b7   :  { %v1591_v51 = vsel %vm1431_vm9, %v1492_v21, 0.0  ;;  %vm808_vm10 = vcmp.eq.s32.totalorder %v3469_v29, %v4262_v45  ;;  %v4263_v21 = vld [vmem:[#allocation109_spill] sm:$0xff] }
 0x2b8   :  { %v1623_v46 = vadd.f32 %v1591_v51, %v1303_v5  ;;  %v968_v58 = vsel %vm808_vm10, %v4263_v21, 0.0  ;;  %v4287_v21 = vld [vmem:[#allocation3_spill] sm:$0xff] }
 0x2b9   :  { %v1403_v61 = vpop.permute.xlu1 %1402  ;;  %v1000_v13 = vadd.f32 %v968_v58, %v648_v56  ;;  %vm458_vm11 = vcmp.eq.s32.totalorder %v3469_v29, %v4287_v21  ;;  %v4288_v58 = vld [vmem:[#allocation129_spill] sm:$0xff]  ;;  %v4291_v56 = vld [vmem:[#allocation94_spill] sm:$0xff]  ;;  %v4312_v21 = vld [vmem:[#allocation67_spill] sm:$0xff] }
 0x2ba   :  { %2049 = vmatmul.mubr.f32.gmra.mrb[8].mxu0 %v1623_v46  ;;  %vm1447_vm2 = vcmp.eq.s32.totalorder %v3469_v29, %v1403_v61  ;;  %v4267_v61 = vld [vmem:[#allocation141_spill] sm:$0xff]  ;;  %v650_v2 = vsel %vm458_vm11, %v4289_v3, 0.0  ;;  %vm811_vm13 = vcmp.eq.s32.totalorder %v3469_v29, %v4291_v56 }
 0x2bb   :  { %v1288_v19 = vsel %vm1128_vm12, %v4267_v61, 0.0  ;;  %vm1130_vm12 = vcmp.eq.s32.totalorder %v3469_v29, %v4288_v58 }
 0x2bc   :  { %v1320_v30 = vadd.f32 %v1288_v19, %v1000_v13  ;;  %v4292_v19 = vld [vmem:[#allocation112_spill] sm:$0xff]  ;;  %v4293_v13 = vld [vmem:[#allocation9_spill] sm:$0xff] }
 0x2bd   :  { %v1552_v47 = vpop.permute.xlu1 %1551  ;;  %v971_v37 = vsel %vm811_vm13, %v4292_v19, 0.0  ;;  %v4317_v19 = vld [vmem:[#allocation130_spill] sm:$0xff] }
 0x2be   :  { %v1606_v41 = vsel %vm1446_vm1, %v1552_v47, 0.0  ;;  %vm1448_vm1 = vcmp.eq.s32.totalorder %v3469_v29, %v1406_v27  ;;  %v4274_v27 = vld [vmem:[#allocation101_spill] sm:$0xff] }
 0x2bf   :  { %v1638_v38 = vadd.f32 %v1606_v41, %v1318_v53  ;;  %v649_v53 = vsel %vm457_vm14, %v4272_v0, 0.0  ;;  %vm459_vm14 = vcmp.eq.s32.totalorder %v3469_v29, %v4293_v13 }
 0x2c0   :  { %v1001_v12 = vadd.f32 %v969_v33, %v649_v53 }
 0x2c1   :  { %v1556_v9 = vpop.permute.xlu1 %1555  ;;  %2072 = vmatprep.mubr.f32.mxu1 %v1638_v38 }
 0x2c2   :  { %v1607_v48 = vsel %vm1447_vm2, %v1556_v9, 0.0  ;;  %v1412_v9 = vpop.permute.xlu0 %1411 }
 0x2c3   :  { %v1639_v43 = vadd.f32 %v1607_v48, %v1319_v25  ;;  %v4273_v48 = vld [vmem:[#allocation83_spill] sm:$0xff] }
 0x2c4   :  { %vm794_vm0 = vcmp.eq.s32.totalorder %v3469_v29, %v4273_v48 }
 0x2c5   :  { %2073 = vmatmul.mubr.f32.gmra.mrb[8].mxu1 %v1639_v43  ;;  %v954_v1 = vsel %vm794_vm0, %v4274_v27, 0.0  ;;  %v4298_v27 = vld [vmem:[#allocation32_spill] sm:$0xff] }
 0x2c6   :  { %v1244_v60 = vpop.permute.xlu1 %1243  ;;  %v986_v35 = vadd.f32 %v954_v1, %v634_v52  ;;  %v1504_v16 = vpop.permute.xlu0 %1503  ;;  %vm444_vm3 = vcmp.eq.s32.totalorder %v3469_v29, %v4298_v27  ;;  %v4300_v1 = vld [vmem:[#allocation52_spill] sm:$0xff]  ;;  %v4302_v52 = vld [vmem:[#allocation86_spill] sm:$0xff] }
 0x2c7   :  { %v1289_v47 = vsel %vm1129_vm15, %v1244_v60, 0.0  ;;  %v4276_v60 = vld [vmem:[#allocation120_spill] sm:$0xff]  ;;  %vm1131_vm15 = vcmp.eq.s32.totalorder %v3469_v29, %v4294_v26  ;;  %v636_v4 = vsel %vm444_vm3, %v4300_v1, 0.0  ;;  %v4318_v26 = vld [vmem:[#allocation69_spill] sm:$0xff] }
 0x2c8   :  { %v1321_v41 = vadd.f32 %v1289_v47, %v1001_v12  ;;  %vm1114_vm4 = vcmp.eq.s32.totalorder %v3469_v29, %v4276_v60  ;;  %v4301_v60 = vld [vmem:[#allocation139_spill] sm:$0xff] }
 0x2c9   :  { %v1274_v49 = vsel %vm1114_vm4, %v4278_v18, 0.0 }
 0x2ca   :  { %v1306_v17 = vadd.f32 %v1274_v49, %v986_v35 }
 0x2cb   :  { %v1358_v39 = vpop.permute.xlu1 %1357 }
 0x2cc   :  { %vm1432_vm8 = vcmp.eq.s32.totalorder %v3469_v29, %v1358_v39  ;;  %v4283_v39 = vld [vmem:[#allocation53_spill] sm:$0xff] }
 0x2cd   :  { %v1592_v28 = vsel %vm1432_vm8, %v1496_v54, 0.0  ;;  %v635_v23 = vsel %vm443_vm5, %v4283_v39, 0.0  ;;  %vm797_vm5 = vcmp.eq.s32.totalorder %v3469_v29, %v4302_v52 }
 0x2ce   :  { %v1624_v34 = vadd.f32 %v1592_v28, %v1304_v63  ;;  %v4284_v63 = vld [vmem:[#allocation136_spill] sm:$0xff]  ;;  %v987_v55 = vadd.f32 %v955_v57, %v635_v23  ;;  %v957_v14 = vsel %vm797_vm5, %v4303_v62, 0.0 }
 0x2cf   :  { %v1361_v32 = vpop.permute.xlu1 %1360  ;;  %v1275_v36 = vsel %vm1115_vm7, %v4284_v63, 0.0  ;;  %vm1117_vm7 = vcmp.eq.s32.totalorder %v3469_v29, %v4305_v7 }
 0x2d0   :  { %vm1433_vm9 = vcmp.eq.s32.totalorder %v3469_v29, %v1361_v32  ;;  %2051 = vmatprep.mubr.f32.mxu0 %v1624_v34  ;;  %v1307_v11 = vadd.f32 %v1275_v36, %v987_v55  ;;  %v1508_v34 = vpop.permute.xlu0 %1507  ;;  %v4285_v32 = vld [vmem:[#allocation93_spill] sm:$0xff] }
 0x2d1   :  { %v1593_v5 = vsel %vm1433_vm9, %v1500_v15, 0.0  ;;  %vm810_vm10 = vcmp.eq.s32.totalorder %v3469_v29, %v4285_v32  ;;  %v4286_v15 = vld [vmem:[#allocation111_spill] sm:$0xff] }
 0x2d2   :  { %v1625_v51 = vadd.f32 %v1593_v5, %v1305_v42  ;;  %v970_v45 = vsel %vm810_vm10, %v4286_v15, 0.0  ;;  %v4310_v15 = vld [vmem:[#allocation4_spill] sm:$0xff] }
 0x2d3   :  { %v1409_v46 = vpop.permute.xlu1 %1408  ;;  %v1002_v61 = vadd.f32 %v970_v45, %v650_v2  ;;  %vm460_vm11 = vcmp.eq.s32.totalorder %v3469_v29, %v4310_v15  ;;  %v4311_v45 = vld [vmem:[#allocation131_spill] sm:$0xff]  ;;  %v4314_v2 = vld [vmem:[#allocation96_spill] sm:$0xff] }
 0x2d4   :  { %2052 = vmatmul.mubr.f32.gmra.mrb[10].mxu0 %v1625_v51  ;;  %vm1449_vm2 = vcmp.eq.s32.totalorder %v3469_v29, %v1409_v46  ;;  %v4290_v46 = vld [vmem:[#allocation142_spill] sm:$0xff]  ;;  %v652_v58 = vsel %vm460_vm11, %v4312_v21, 0.0  ;;  %vm813_vm13 = vcmp.eq.s32.totalorder %v3469_v29, %v4314_v2 }
 0x2d5   :  { %v1290_v31 = vsel %vm1130_vm12, %v4290_v46, 0.0  ;;  %vm1132_vm12 = vcmp.eq.s32.totalorder %v3469_v29, %v4311_v45 }
 0x2d6   :  { %v1322_v33 = vadd.f32 %v1290_v31, %v1002_v61  ;;  %v4315_v31 = vld [vmem:[#allocation114_spill] sm:$0xff]  ;;  %v4316_v61 = vld [vmem:[#allocation8_spill] sm:$0xff] }
 0x2d7   :  { %v1560_v6 = vpop.permute.xlu1 %1559  ;;  %v973_v56 = vsel %vm813_vm13, %v4315_v31, 0.0 }
 0x2d8   :  { %v1608_v22 = vsel %vm1448_vm1, %v1560_v6, 0.0  ;;  %vm1450_vm1 = vcmp.eq.s32.totalorder %v3469_v29, %v1412_v9  ;;  %v4297_v9 = vld [vmem:[#allocation103_spill] sm:$0xff] }
 0x2d9   :  { %v1640_v40 = vadd.f32 %v1608_v22, %v1320_v30  ;;  %v651_v30 = vsel %vm459_vm14, %v4295_v44, 0.0  ;;  %vm461_vm14 = vcmp.eq.s32.totalorder %v3469_v29, %v4316_v61 }
 0x2da   :  { %v1003_v53 = vadd.f32 %v971_v37, %v651_v30 }
 0x2db   :  { %v1564_v20 = vpop.permute.xlu1 %1563  ;;  %2075 = vmatprep.mubr.f32.mxu1 %v1640_v40 }
 0x2dc   :  { %v1609_v38 = vsel %vm1449_vm2, %v1564_v20, 0.0  ;;  %v1418_v20 = vpop.permute.xlu0 %1417 }
 0x2dd   :  { %v1641_v25 = vadd.f32 %v1609_v38, %v1321_v41  ;;  %v4296_v38 = vld [vmem:[#allocation85_spill] sm:$0xff] }
 0x2de   :  { %vm796_vm0 = vcmp.eq.s32.totalorder %v3469_v29, %v4296_v38 }
 0x2df   :  { %2076 = vmatmul.mubr.f32.gmra.mrb[10].mxu1 %v1641_v25  ;;  %v956_v48 = vsel %vm796_vm0, %v4297_v9, 0.0  ;;  %vm1887_vm0 = vcmask 261120  }
 0x2e0   :  { %v1252_v43 = vpop.permute.xlu1 %1251  ;;  %v988_v18 = vadd.f32 %v956_v48, %v636_v4  ;;  %v1512_v49 = vpop.permute.xlu0 %1511 }
 0x2e1   :  { %v1291_v6 = vsel %vm1131_vm15, %v1252_v43, 0.0  ;;  %v4299_v43 = vld [vmem:[#allocation122_spill] sm:$0xff]  ;;  %vm1133_vm15 = vcmp.eq.s32.totalorder %v3469_v29, %v4317_v19 }
 0x2e2   :  { %v1323_v22 = vadd.f32 %v1291_v6, %v1003_v53  ;;  %vm1116_vm4 = vcmp.eq.s32.totalorder %v3469_v29, %v4299_v43 }
 0x2e3   :  { %v1276_v10 = vsel %vm1116_vm4, %v4301_v60, 0.0 }
 0x2e4   :  { %v1308_v57 = vadd.f32 %v1276_v10, %v988_v18 }
 0x2e5   :  { %v1364_v54 = vpop.permute.xlu1 %1363 }
 0x2e6   :  { %vm1434_vm8 = vcmp.eq.s32.totalorder %v3469_v29, %v1364_v54  ;;  %v4306_v54 = vld [vmem:[#allocation55_spill] sm:$0xff] }
 0x2e7   :  { %v1594_v24 = vsel %vm1434_vm8, %v1504_v16, 0.0  ;;  %v4304_v16 = vld [vmem:[#allocation28_spill] sm:$0xff] }
 0x2e8   :  { %v1626_v8 = vadd.f32 %v1594_v24, %v1306_v17  ;;  %vm445_vm6 = vcmp.eq.s32.totalorder %v3469_v29, %v4304_v16  ;;  %v4307_v17 = vld [vmem:[#allocation138_spill] sm:$0xff] }
 0x2e9   :  { %v1367_v28 = vpop.permute.xlu1 %1366  ;;  %v637_v50 = vsel %vm445_vm6, %v4306_v54, 0.0  ;;  %v1277_v39 = vsel %vm1117_vm7, %v4307_v17, 0.0 }
 0x2ea   :  { %vm1435_vm9 = vcmp.eq.s32.totalorder %v3469_v29, %v1367_v28  ;;  %2054 = vmatprep.mubr.f32.mxu0 %v1626_v8  ;;  %v989_v63 = vadd.f32 %v957_v14, %v637_v50  ;;  %v1516_v8 = vpop.permute.xlu0 %1515  ;;  %v4308_v28 = vld [vmem:[#allocation95_spill] sm:$0xff] }
 0x2eb   :  { %v1595_v42 = vsel %vm1435_vm9, %v1508_v34, 0.0  ;;  %vm812_vm10 = vcmp.eq.s32.totalorder %v3469_v29, %v4308_v28  ;;  %v4309_v34 = vld [vmem:[#allocation113_spill] sm:$0xff] }
 0x2ec   :  { %v1627_v5 = vadd.f32 %v1595_v42, %v1307_v11  ;;  %v1309_v55 = vadd.f32 %v1277_v39, %v989_v63  ;;  %v972_v32 = vsel %vm812_vm10, %v4309_v34, 0.0 }
 0x2ed   :  { %v1415_v51 = vpop.permute.xlu1 %1414  ;;  %v1004_v46 = vadd.f32 %v972_v32, %v652_v58 }
 0x2ee   :  { %2055 = vmatmul.mubr.f32.gmra.mrb[12].mxu0 %v1627_v5  ;;  %vm1451_vm2 = vcmp.eq.s32.totalorder %v3469_v29, %v1415_v51  ;;  %v4313_v51 = vld [vmem:[#allocation72_spill] sm:$0xff] }
 0x2ef   :  { %v1292_v3 = vsel %vm1132_vm12, %v4313_v51, 0.0 }
 0x2f0   :  { %v1324_v37 = vadd.f32 %v1292_v3, %v1004_v46 }
 0x2f1   :  { %v1568_v59 = vpop.permute.xlu1 %1567 }
 0x2f2   :  { %v1610_v0 = vsel %vm1450_vm1, %v1568_v59, 0.0  ;;  %vm1452_vm1 = vcmp.eq.s32.totalorder %v3469_v29, %v1418_v20 }
 0x2f3   :  { %v1642_v47 = vadd.f32 %v1610_v0, %v1322_v33  ;;  %v653_v33 = vsel %vm461_vm14, %v4318_v26, 0.0 }
 0x2f4   :  { %v1005_v30 = vadd.f32 %v973_v56, %v653_v33 }
 0x2f5   :  { %v1572_v12 = vpop.permute.xlu1 %1571  ;;  %2078 = vmatprep.mubr.f32.mxu1 %v1642_v47 }
 0x2f6   :  { %v1611_v40 = vsel %vm1451_vm2, %v1572_v12, 0.0 }
 0x2f7   :  { %v1643_v41 = vadd.f32 %v1611_v40, %v1323_v22 }
 0x2f9   :  { %2079 = vmatmul.mubr.f32.gmra.mrb[12].mxu1 %v1643_v41 }
 0x2fa   :  { %v1260_v25 = vpop.permute.xlu1 %1259 }
 0x2fb   :  { %v1293_v59 = vsel %vm1133_vm15, %v1260_v25, 0.0 }
 0x2fc   :  { %v1325_v0 = vadd.f32 %v1293_v59, %v1005_v30 }
 0x2ff   :  { %v1370_v35 = vpop.permute.xlu1 %1369 }
 0x300   :  { %vm1436_vm8 = vcmp.eq.s32.totalorder %v3469_v29, %v1370_v35 }
 0x301   :  { %v1596_v23 = vsel %vm1436_vm8, %v1512_v49, 0.0 }
 0x302   :  { %v1628_v36 = vadd.f32 %v1596_v23, %v1308_v57 }
 0x303   :  { %v1373_v24 = vpop.permute.xlu1 %1372 }
 0x304   :  { %vm1437_vm9 = vcmp.eq.s32.totalorder %v3469_v29, %v1373_v24  ;;  %2057 = vmatprep.mubr.f32.mxu0 %v1628_v36 }
 0x305   :  { %v1597_v11 = vsel %vm1437_vm9, %v1516_v8, 0.0 }
 0x306   :  { %v1629_v42 = vadd.f32 %v1597_v11, %v1309_v55 }
 0x307   :  { %v1421_v5 = vpop.permute.xlu1 %1420 }
 0x308   :  { %2058 = vmatmul.mubr.f32.gmra.mrb[14].mxu0 %v1629_v42  ;;  %vm1453_vm2 = vcmp.eq.s32.totalorder %v3469_v29, %v1421_v5 }
 0x30b   :  { %v1576_v13 = vpop.permute.xlu1 %1575 }
 0x30c   :  { %v1612_v44 = vsel %vm1452_vm1, %v1576_v13, 0.0 }
 0x30d   :  { %v1644_v6 = vadd.f32 %v1612_v44, %v1324_v37 }
 0x30f   :  { %v1580_v53 = vpop.permute.xlu1 %1579  ;;  %2081 = vmatprep.mubr.f32.mxu1 %v1644_v6 }
 0x310   :  { %v1613_v47 = vsel %vm1453_vm2, %v1580_v53, 0.0 }
 0x311   :  { %v1645_v22 = vadd.f32 %v1613_v47, %v1325_v0 }
 0x313   :  { %2082 = vmatmul.mubr.f32.gmra.mrb[14].mxu1 %v1645_v22 }
 0x33a   :  { %v2038_v12 = vpop.f32.mrb[0].mxu0 }
 0x33b   :  { %1889 = vst.msk [vmem:[%s3951_s2 + $0x8] sm:$0xff] %vm1887_vm0, %v2038_v12  ;;  %v1728_v40 = vpop.f32.mrb[1].mxu0 }
 0x33c   :  { %1888 = vst.msk [vmem:[%s3951_s2] sm:$0xff] %vm1887_vm0, %v1728_v40 }
 0x344   :  { %v2062_v41 = vpop.f32.mrb[0].mxu1 }
 0x345   :  { %1905 = vst.msk [vmem:[%s3951_s2 + $0x88] sm:$0xff] %vm1887_vm0, %v2062_v41  ;;  %v1808_v29 = vpop.f32.mrb[1].mxu1 }
 0x346   :  { %1904 = vst.msk [vmem:[%s3951_s2 + $0x80] sm:$0xff] %vm1887_vm0, %v1808_v29 }
 0x34a   :  { %v2065_v20 = vpop.f32.mrb[2].mxu1 }
 0x34b   :  { %1907 = vst.msk [vmem:[%s3951_s2 + $0x98] sm:$0xff] %vm1887_vm0, %v2065_v20  ;;  %v1818_v38 = vpop.f32.mrb[3].mxu1 }
 0x34c   :  { %1906 = vst.msk [vmem:[%s3951_s2 + $0x90] sm:$0xff] %vm1887_vm0, %v1818_v38 }
 0x354   :  { %v2041_v25 = vpop.f32.mrb[2].mxu0 }
 0x355   :  { %1891 = vst.msk [vmem:[%s3951_s2 + $0x18] sm:$0xff] %vm1887_vm0, %v2041_v25  ;;  %v1738_v9 = vpop.f32.mrb[3].mxu0 }
 0x356   :  { %1890 = vst.msk [vmem:[%s3951_s2 + $0x10] sm:$0xff] %vm1887_vm0, %v1738_v9 }
 0x360   :  { %v2044_v48 = vpop.f32.mrb[4].mxu0 }
 0x361   :  { %1893 = vst.msk [vmem:[%s3951_s2 + $0x28] sm:$0xff] %vm1887_vm0, %v2044_v48  ;;  %v1748_v27 = vpop.f32.mrb[5].mxu0 }
 0x362   :  { %1892 = vst.msk [vmem:[%s3951_s2 + $0x20] sm:$0xff] %vm1887_vm0, %v1748_v27 }
 0x364   :  { %v2068_v43 = vpop.f32.mrb[4].mxu1 }
 0x365   :  { %1909 = vst.msk [vmem:[%s3951_s2 + $0xa8] sm:$0xff] %vm1887_vm0, %v2068_v43  ;;  %v1828_v1 = vpop.f32.mrb[5].mxu1 }
 0x366   :  { %1908 = vst.msk [vmem:[%s3951_s2 + $0xa0] sm:$0xff] %vm1887_vm0, %v1828_v1 }
 0x373   :  { %v2047_v4 = vpop.f32.mrb[6].mxu0 }
 0x374   :  { %1895 = vst.msk [vmem:[%s3951_s2 + $0x38] sm:$0xff] %vm1887_vm0, %v2047_v4  ;;  %v1758_v60 = vpop.f32.mrb[7].mxu0 }
 0x375   :  { %1894 = vst.msk [vmem:[%s3951_s2 + $0x30] sm:$0xff] %vm1887_vm0, %v1758_v60 }
 0x37e   :  { %v2071_v10 = vpop.f32.mrb[6].mxu1 }
 0x37f   :  { %1911 = vst.msk [vmem:[%s3951_s2 + $0xb8] sm:$0xff] %vm1887_vm0, %v2071_v10  ;;  %v1838_v52 = vpop.f32.mrb[7].mxu1 }
 0x380   :  { %1910 = vst.msk [vmem:[%s3951_s2 + $0xb0] sm:$0xff] %vm1887_vm0, %v1838_v52 }
 0x38d   :  { %v2050_v18 = vpop.f32.mrb[8].mxu0 }
 0x38e   :  { %1897 = vst.msk [vmem:[%s3951_s2 + $0x48] sm:$0xff] %vm1887_vm0, %v2050_v18  ;;  %v1768_v49 = vpop.f32.mrb[9].mxu0 }
 0x38f   :  { %1896 = vst.msk [vmem:[%s3951_s2 + $0x40] sm:$0xff] %vm1887_vm0, %v1768_v49 }
 0x398   :  { %v2074_v62 = vpop.f32.mrb[8].mxu1 }
 0x399   :  { %1913 = vst.msk [vmem:[%s3951_s2 + $0xc8] sm:$0xff] %vm1887_vm0, %v2074_v62  ;;  %v1848_v14 = vpop.f32.mrb[9].mxu1 }
 0x39a   :  { %1912 = vst.msk [vmem:[%s3951_s2 + $0xc0] sm:$0xff] %vm1887_vm0, %v1848_v14 }
 0x3a7   :  { %v2053_v35 = vpop.f32.mrb[10].mxu0 }
 0x3a8   :  { %1899 = vst.msk [vmem:[%s3951_s2 + $0x58] sm:$0xff] %vm1887_vm0, %v2053_v35  ;;  %v1778_v16 = vpop.f32.mrb[11].mxu0 }
 0x3a9   :  { %1898 = vst.msk [vmem:[%s3951_s2 + $0x50] sm:$0xff] %vm1887_vm0, %v1778_v16 }
 0x3b2   :  { %v2077_v7 = vpop.f32.mrb[10].mxu1 }
 0x3b3   :  { %1915 = vst.msk [vmem:[%s3951_s2 + $0xd8] sm:$0xff] %vm1887_vm0, %v2077_v7  ;;  %v1858_v57 = vpop.f32.mrb[11].mxu1 }
 0x3b4   :  { %1914 = vst.msk [vmem:[%s3951_s2 + $0xd0] sm:$0xff] %vm1887_vm0, %v1858_v57 }
 0x3c1   :  { %v2056_v54 = vpop.f32.mrb[12].mxu0 }
 0x3c2   :  { %1901 = vst.msk [vmem:[%s3951_s2 + $0x68] sm:$0xff] %vm1887_vm0, %v2056_v54  ;;  %v1788_v50 = vpop.f32.mrb[13].mxu0 }
 0x3c3   :  { %1900 = vst.msk [vmem:[%s3951_s2 + $0x60] sm:$0xff] %vm1887_vm0, %v1788_v50 }
 0x3cc   :  { %v2080_v17 = vpop.f32.mrb[12].mxu1 }
 0x3cd   :  { %1917 = vst.msk [vmem:[%s3951_s2 + $0xe8] sm:$0xff] %vm1887_vm0, %v2080_v17  ;;  %v1868_v39 = vpop.f32.mrb[13].mxu1 }
 0x3ce   :  { %1916 = vst.msk [vmem:[%s3951_s2 + $0xe0] sm:$0xff] %vm1887_vm0, %v1868_v39 }
 0x3db   :  { %v2059_v23 = vpop.f32.mrb[14].mxu0 }
 0x3dc   :  { %1903 = vst.msk [vmem:[%s3951_s2 + $0x78] sm:$0xff] %vm1887_vm0, %v2059_v23  ;;  %v1798_v63 = vpop.f32.mrb[15].mxu0 }
 0x3dd   :  { %1902 = vst.msk [vmem:[%s3951_s2 + $0x70] sm:$0xff] %vm1887_vm0, %v1798_v63 }
 0x3e6   :  { %v2083_v36 = vpop.f32.mrb[14].mxu1 }
 0x3e7   :  { %1919 = vst.msk [vmem:[%s3951_s2 + $0xf8] sm:$0xff] %vm1887_vm0, %v2083_v36  ;;  %v1878_v24 = vpop.f32.mrb[15].mxu1 }
 0x3e8   :  { %1918 = vst.msk [vmem:[%s3951_s2 + $0xf0] sm:$0xff] %vm1887_vm0, %v1878_v24 }

</bundles_post_ra>
